<compile_context>
chip_gen: v7x
topology: tpu7x:2x2x1
jax: 0.10.0
libtpu: 0.0.40
codegen_flags: <defaults>
</compile_context>

<pallas_src>
import functools
import math

import jax
import jax.numpy as jnp
from jax.experimental import pallas as pl
from jax.experimental.pallas import tpu as pltpu

d_k = 64
heads = 12


def _ceil_to(a, b):
    return (a + b - 1) // b * b


def _block_bytes(tq, S, attn_itemsize, lane_dense_out):
    """Approximate single-buffer VMEM footprint of one grid step (with lane padding)."""
    s_lane = _ceil_to(S, 128)
    s_sub = _ceil_to(S, 8)
    tq_sub = _ceil_to(tq, 8)
    qb = heads * tq_sub * 128 * 4                 # q block, D=64 padded to 128 lanes
    kb = heads * s_sub * 128 * 4                  # k block
    vb = kb                                       # v block
    mb = tq_sub * s_lane * 1                      # int8 mask block
    if lane_dense_out:
        ob = tq_sub * _ceil_to(heads * d_k, 128) * 4
    else:
        ob = heads * tq_sub * 128 * 4
    ab = heads * tq_sub * s_lane * attn_itemsize  # attn block (dominant)
    return qb + kb + vb + mb + ob + ab


def _pick_tq(S, B, q_tile, budget_bytes, attn_itemsize, lane_dense_out):
    """Largest divisor-of-S query tile (multiple of 8, or S) that fits the VMEM budget."""
    cands = sorted({d for d in range(8, S + 1, 8) if S % d == 0} | {S}, reverse=True)

    def fits(t):
        return 2 * _block_bytes(t, S, attn_itemsize, lane_dense_out) <= budget_bytes

    # With B == 1 both TCs only get work if the qi axis has >= 2 steps.
    want_split = (B == 1) and any(c < S for c in cands)
    passes = [True, False] if want_split else [False]
    for require_split in passes:
        for t in cands:
            if t > q_tile:
                continue
            if require_split and t >= S:
                continue
            if fits(t):
                return t
    # Nothing <= q_tile fits: best effort — largest candidate that fits, else smallest.
    for t in cands:
        if fits(t):
            return t
    return cands[-1]


def _cal_attn_kernel(q_ref, k_ref, v_ref, mask_ref, out_ref, attn_ref,
                     *, use_bf16: bool, lane_dense_out: bool):
    # One (batch, query-tile) grid step; all heads processed together.
    q = q_ref[0]          # (H, TQ, D)
    k = k_ref[0]          # (H, S,  D)
    v = v_ref[0]          # (H, S,  D)
    mask = mask_ref[0]    # (TQ, S) int8, nonzero => masked; shared across heads

    # Pre-scale q by 1/sqrt(d_k) (exact: 0.125): H*TQ*D multiplies, not H*TQ*S.
    q = q * jnp.float32(1.0 / math.sqrt(d_k))

    if use_bf16:
        q = q.astype(jnp.bfloat16)
        k = k.astype(jnp.bfloat16)

    # scores = (q / sqrt(d_k)) @ k^T, contracting D directly -> no k.T / XLU.
    scores = jnp.einsum("hqd,hkd->hqk", q, k,
                        preferred_element_type=jnp.float32)       # (H, TQ, S)

    # masked_fill_(mask, -1e9); (TQ, S) mask broadcast over heads.
    scores = jnp.where(mask[None, :, :] != 0,
                       jnp.float32(-1000000000.0), scores)

    # Numerically-stable softmax over the key axis (always in f32).
    m = jnp.max(scores, axis=-1, keepdims=True)
    e = jnp.exp(scores - m)
    denom = jnp.sum(e, axis=-1, keepdims=True)
    # approx=True (EUP-only reciprocal) only in the relaxed-precision path.
    attn = e * pl.reciprocal(denom, approx=use_bf16)

    attn_ref[0] = attn.astype(attn_ref.dtype)

    p = attn.astype(jnp.bfloat16) if use_bf16 else attn
    vv = v.astype(jnp.bfloat16) if use_bf16 else v

    if lane_dense_out:
        # Write a (TQ, H*D) lane-dense slab: one (TQ,S)@(S,D) MXU dot per head,
        # stored into a static 64-wide lane slice of the 768-lane output block.
        for h in range(heads):
            oh = jnp.dot(p[h], vv[h], preferred_element_type=jnp.float32)
            out_ref[0, :, h * d_k:(h + 1) * d_k] = oh.astype(out_ref.dtype)
    else:
        out = jnp.einsum("hqk,hkd->hqd", p, vv,
                         preferred_element_type=jnp.float32)      # (H, TQ, D)
        out_ref[0] = out.astype(out_ref.dtype)


def cal_attn(q, k, v, attn_pad_mask, *, use_bf16=False,
             attn_dtype=jnp.float32, q_tile=128, lane_dense_out=True,
             vmem_budget_bytes=48 * 1024 * 1024):
    """q,k,v: [B,H,S,D] float32; attn_pad_mask: [B,S,S] (nonzero => masked).

    Returns (out_put [B,H,S,D], attn [B,H,S,S] in attn_dtype).
    Set attn_dtype=jnp.bfloat16 to halve the dominant HBM writeback when the
    consumer tolerates it; use_bf16=True feeds bf16 operands to the MXU
    (worth it mainly on v5e; softmax math stays f32).
    """
    B, H, S, D = q.shape
    assert H == heads and D == d_k
    assert attn_pad_mask.shape == (B, S, S)

    # Narrow the mask to int8 in the wrapper: 4x less mask DMA / VMEM.
    mask_i8 = (attn_pad_mask != 0).astype(jnp.int8)

    attn_itemsize = jnp.dtype(attn_dtype).itemsize
    tq = _pick_tq(S, B, q_tile, vmem_budget_bytes, attn_itemsize, lane_dense_out)
    grid = (B, S // tq)

    # Explicit scoped-VMEM limit: double-buffered blocks + headroom.
    blk = _block_bytes(tq, S, attn_itemsize, lane_dense_out)
    vmem_limit = int(min(max(2 * blk + blk // 2 + (2 << 20), 32 << 20), 128 << 20))

    q_spec = pl.BlockSpec((1, H, tq, D), lambda b, qi: (b, 0, qi, 0))
    kv_spec = pl.BlockSpec((1, H, S, D), lambda b, qi: (b, 0, 0, 0))
    mask_spec = pl.BlockSpec((1, tq, S), lambda b, qi: (b, qi, 0))
    attn_spec = pl.BlockSpec((1, H, tq, S), lambda b, qi: (b, 0, qi, 0))

    if lane_dense_out:
        out_spec = pl.BlockSpec((1, tq, H * D), lambda b, qi: (b, qi, 0))
        out_shape0 = jax.ShapeDtypeStruct((B, S, H * D), q.dtype)
    else:
        out_spec = pl.BlockSpec((1, H, tq, D), lambda b, qi: (b, 0, qi, 0))
        out_shape0 = jax.ShapeDtypeStruct((B, H, S, D), q.dtype)

    kernel = functools.partial(_cal_attn_kernel, use_bf16=use_bf16,
                               lane_dense_out=lane_dense_out)

    out_put, attn = pl.pallas_call(
        kernel,
        out_shape=(out_shape0,
                   jax.ShapeDtypeStruct((B, H, S, S), attn_dtype)),
        grid=grid,
        in_specs=[q_spec, kv_spec, kv_spec, mask_spec],
        out_specs=(out_spec, attn_spec),
        compiler_params=pltpu.CompilerParams(
            dimension_semantics=("parallel", "parallel"),
            vmem_limit_bytes=vmem_limit),
    )(q, k, v, mask_i8)

    if lane_dense_out:
        # Layout plumbing back to the module's [B, H, S, D] interface.
        out_put = jnp.transpose(out_put.reshape(B, S, H, D), (0, 2, 1, 3))
    return out_put, attn


def _reference(q, k, v, attn_pad_mask):
    scores = jnp.einsum("bhqd,bhkd->bhqk", q, k) / math.sqrt(d_k)
    mask = (attn_pad_mask[:, None, :, :] != 0)
    scores = jnp.where(mask, -1000000000.0, scores)
    attn = jax.nn.softmax(scores, axis=-1)
    out = jnp.einsum("bhqk,bhkd->bhqd", attn, v)
    return out, attn


if __name__ == "__main__":
    key = jax.random.PRNGKey(0)

    # --- Test 1: default f32 path, B=2, S=8 -------------------------------
    B, H, S, D = 2, heads, 8, d_k
    kq, kk, kv, km, key = jax.random.split(key, 5)
    q = jax.random.normal(kq, (B, H, S, D), dtype=jnp.float32)
    k = jax.random.normal(kk, (B, H, S, D), dtype=jnp.float32)
    v = jax.random.normal(kv, (B, H, S, D), dtype=jnp.float32)
    attn_pad_mask = jax.random.bernoulli(km, 0.25, (B, S, S)).astype(jnp.int32)

    ref_out, ref_attn = _reference(q, k, v, attn_pad_mask)
    out_put, attn = cal_attn(q, k, v, attn_pad_mask)
    jax.block_until_ready((out_put, attn))
    assert out_put.shape == (B, H, S, D) and attn.shape == (B, H, S, S)
    assert jnp.allclose(out_put, ref_out, atol=1e-4, rtol=1e-4)
    assert jnp.allclose(attn, ref_attn, atol=1e-5, rtol=1e-4)

    # --- Test 2: B=1 multi-tile path (qi axis gets 2 steps automatically) --
    B2, S2 = 1, 16
    kq2, kk2, kv2, km2, key = jax.random.split(key, 5)
    q2 = jax.random.normal(kq2, (B2, H, S2, D), dtype=jnp.float32)
    k2 = jax.random.normal(kk2, (B2, H, S2, D), dtype=jnp.float32)
    v2 = jax.random.normal(kv2, (B2, H, S2, D), dtype=jnp.float32)
    m2 = jax.random.bernoulli(km2, 0.25, (B2, S2, S2)).astype(jnp.int32)
    ref_out2, ref_attn2 = _reference(q2, k2, v2, m2)
    out2, attn2 = cal_attn(q2, k2, v2, m2)
    jax.block_until_ready((out2, attn2))
    assert jnp.allclose(out2, ref_out2, atol=1e-4, rtol=1e-4)
    assert jnp.allclose(attn2, ref_attn2, atol=1e-5, rtol=1e-4)

    # --- Test 3: relaxed-precision path (bf16 MXU + bf16 attn writeback) ---
    out_bf, attn_bf = cal_attn(q, k, v, attn_pad_mask,
                               use_bf16=True, attn_dtype=jnp.bfloat16)
    jax.block_until_ready((out_bf, attn_bf))
    assert jnp.allclose(out_bf, ref_out, atol=5e-2, rtol=5e-2)
    assert jnp.allclose(attn_bf.astype(jnp.float32), ref_attn, atol=5e-2, rtol=5e-2)

    print("KERNEL_OK")
</pallas_src>

<mosaic_0001>
module attributes {stable_mosaic.version = 11 : i64} {
  func.func @_cal_attn_kernel(%arg0: i32, %arg1: i32, %arg2: memref<1x12x8x64xf32, #tpu.memory_space<vmem>>, %arg3: memref<1x12x8x64xf32, #tpu.memory_space<vmem>>, %arg4: memref<1x12x8x64xf32, #tpu.memory_space<vmem>>, %arg5: memref<1x8x8xi8, #tpu.memory_space<vmem>>, %arg6: memref<1x8x768xf32, #tpu.memory_space<vmem>>, %arg7: memref<1x12x8x8xf32, #tpu.memory_space<vmem>>) attributes {dimension_semantics = [#tpu.dimension_semantics<parallel>, #tpu.dimension_semantics<parallel>], iteration_bounds = array<i64: 2, 1>, scalar_prefetch = 0 : i64, scratch_operands = 0 : i64, tpu.core_type = #tpu.core_type<tc>, window_params = [{transform_indices = @transform_0, window_bounds = array<i64: 1, 12, 8, 64>}, {transform_indices = @transform_1, window_bounds = array<i64: 1, 12, 8, 64>}, {transform_indices = @transform_2, window_bounds = array<i64: 1, 12, 8, 64>}, {transform_indices = @transform_3, window_bounds = array<i64: 1, 8, 8>}, {transform_indices = @transform_4, window_bounds = array<i64: 1, 8, 768>}, {transform_indices = @transform_5, window_bounds = array<i64: 1, 12, 8, 8>}]} {
    %c0 = arith.constant 0 : index
    %c0_0 = arith.constant 0 : index
    %c0_1 = arith.constant 0 : index
    %c0_2 = arith.constant 0 : index
    %0 = vector.load %arg2[%c0, %c0_0, %c0_1, %c0_2] : memref<1x12x8x64xf32, #tpu.memory_space<vmem>>, vector<1x12x8x64xf32>
    %1 = vector.shape_cast %0 : vector<1x12x8x64xf32> to vector<12x8x64xf32>
    %c0_3 = arith.constant 0 : index
    %c0_4 = arith.constant 0 : index
    %c0_5 = arith.constant 0 : index
    %c0_6 = arith.constant 0 : index
    %2 = vector.load %arg3[%c0_3, %c0_4, %c0_5, %c0_6] : memref<1x12x8x64xf32, #tpu.memory_space<vmem>>, vector<1x12x8x64xf32>
    %3 = vector.shape_cast %2 : vector<1x12x8x64xf32> to vector<12x8x64xf32>
    %c0_7 = arith.constant 0 : index
    %c0_8 = arith.constant 0 : index
    %c0_9 = arith.constant 0 : index
    %c0_10 = arith.constant 0 : index
    %4 = vector.load %arg4[%c0_7, %c0_8, %c0_9, %c0_10] : memref<1x12x8x64xf32, #tpu.memory_space<vmem>>, vector<1x12x8x64xf32>
    %5 = vector.shape_cast %4 : vector<1x12x8x64xf32> to vector<12x8x64xf32>
    %c0_11 = arith.constant 0 : index
    %c0_12 = arith.constant 0 : index
    %c0_13 = arith.constant 0 : index
    %6 = vector.load %arg5[%c0_11, %c0_12, %c0_13] : memref<1x8x8xi8, #tpu.memory_space<vmem>>, vector<1x8x8xi8>
    %7 = vector.shape_cast %6 : vector<1x8x8xi8> to vector<8x8xi8>
    %cst = arith.constant 1.250000e-01 : f32
    %8 = vector.broadcast %cst : f32 to vector<12x8x64xf32>
    %9 = arith.mulf %1, %8 : vector<12x8x64xf32>
    "tpu.trace_start"() <{level = 10 : i32, message = "hqd,hkd->hqk"}> : () -> ()
    %cst_14 = arith.constant dense<0.000000e+00> : vector<12x8x8xf32>
    %10 = tpu.matmul %9, %3, %cst_14 {dimension_numbers = #tpu.dot_dimension_numbers<[2], [2], [1], [1], [0, 0, 0, 1, 1, 1], [0], [0]>} : vector<12x8x64xf32>, vector<12x8x64xf32>, vector<12x8x8xf32> -> vector<12x8x8xf32>
    "tpu.trace_stop"() : () -> ()
    %11 = vector.shape_cast %7 : vector<8x8xi8> to vector<1x8x8xi8>
    %c0_i8 = arith.constant 0 : i8
    %12 = vector.broadcast %c0_i8 : i8 to vector<1x8x8xi8>
    %13 = arith.cmpi ne, %11, %12 : vector<1x8x8xi8>
    %cst_15 = arith.constant -1.000000e+09 : f32
    %14 = vector.shape_cast %13 : vector<1x8x8xi1> to vector<1x8x8xi1>
    %15 = vector.broadcast %14 : vector<1x8x8xi1> to vector<12x8x8xi1>
    %16 = vector.broadcast %cst_15 : f32 to vector<12x8x8xf32>
    %17 = arith.select %15, %16, %10 : vector<12x8x8xi1>, vector<12x8x8xf32>
    %cst_16 = arith.constant dense<0xFF800000> : vector<12x8xf32>
    %18 = vector.multi_reduction <maximumf>, %17, %cst_16 [2] : vector<12x8x8xf32> to vector<12x8xf32>
    %19 = vector.shape_cast %18 : vector<12x8xf32> to vector<12x8x1xf32>
    %20 = vector.broadcast %19 : vector<12x8x1xf32> to vector<12x8x8xf32>
    %21 = arith.subf %17, %20 : vector<12x8x8xf32>
    %22 = math.exp %21 : vector<12x8x8xf32>
    %cst_17 = arith.constant dense<0.000000e+00> : vector<12x8xf32>
    %23 = vector.multi_reduction <add>, %22, %cst_17 [2] : vector<12x8x8xf32> to vector<12x8xf32>
    %24 = vector.shape_cast %23 : vector<12x8xf32> to vector<12x8x1xf32>
    %25 = tpu.reciprocal %24 : vector<12x8x1xf32> -> vector<12x8x1xf32>
    %26 = vector.broadcast %25 : vector<12x8x1xf32> to vector<12x8x8xf32>
    %27 = arith.mulf %22, %26 : vector<12x8x8xf32>
    %c0_18 = arith.constant 0 : index
    %c0_19 = arith.constant 0 : index
    %c0_20 = arith.constant 0 : index
    %c0_21 = arith.constant 0 : index
    %28 = vector.load %arg7[%c0_18, %c0_19, %c0_20, %c0_21] : memref<1x12x8x8xf32, #tpu.memory_space<vmem>>, vector<1x12x8x8xf32>
    %29 = vector.shape_cast %28 : vector<1x12x8x8xf32> to vector<12x8x8xf32>
    %30 = vector.shape_cast %27 : vector<12x8x8xf32> to vector<1x12x8x8xf32>
    tpu.vector_store %arg7[%c0_18, %c0_19, %c0_20, %c0_21], %30 {strides = array<i32>} : memref<1x12x8x8xf32, #tpu.memory_space<vmem>>, vector<1x12x8x8xf32>,
    %31 = vector.extract_strided_slice %27 {offsets = [0, 0, 0], sizes = [1, 8, 8], strides = [1, 1, 1]} : vector<12x8x8xf32> to vector<1x8x8xf32>
    %32 = vector.shape_cast %31 : vector<1x8x8xf32> to vector<8x8xf32>
    %33 = vector.extract_strided_slice %5 {offsets = [0, 0, 0], sizes = [1, 8, 64], strides = [1, 1, 1]} : vector<12x8x64xf32> to vector<1x8x64xf32>
    %34 = vector.shape_cast %33 : vector<1x8x64xf32> to vector<8x64xf32>
    %cst_22 = arith.constant dense<0.000000e+00> : vector<8x64xf32>
    %35 = tpu.matmul %32, %34, %cst_22 {dimension_numbers = #tpu.dot_dimension_numbers<[1], [0], [0], [1], [0, 0, 1, 1], [], []>} : vector<8x8xf32>, vector<8x64xf32>, vector<8x64xf32> -> vector<8x64xf32>
    %c0_23 = arith.constant 0 : index
    %c0_24 = arith.constant 0 : index
    %c0_25 = arith.constant 0 : index
    %36 = vector.load %arg6[%c0_23, %c0_24, %c0_25] : memref<1x8x768xf32, #tpu.memory_space<vmem>>, vector<1x8x64xf32>
    %37 = vector.shape_cast %36 : vector<1x8x64xf32> to vector<8x64xf32>
    %38 = vector.shape_cast %35 : vector<8x64xf32> to vector<1x8x64xf32>
    tpu.vector_store %arg6[%c0_23, %c0_24, %c0_25], %38 {strides = array<i32>} : memref<1x8x768xf32, #tpu.memory_space<vmem>>, vector<1x8x64xf32>,
    %39 = vector.extract_strided_slice %27 {offsets = [1, 0, 0], sizes = [1, 8, 8], strides = [1, 1, 1]} : vector<12x8x8xf32> to vector<1x8x8xf32>
    %40 = vector.shape_cast %39 : vector<1x8x8xf32> to vector<8x8xf32>
    %41 = vector.extract_strided_slice %5 {offsets = [1, 0, 0], sizes = [1, 8, 64], strides = [1, 1, 1]} : vector<12x8x64xf32> to vector<1x8x64xf32>
    %42 = vector.shape_cast %41 : vector<1x8x64xf32> to vector<8x64xf32>
    %cst_26 = arith.constant dense<0.000000e+00> : vector<8x64xf32>
    %43 = tpu.matmul %40, %42, %cst_26 {dimension_numbers = #tpu.dot_dimension_numbers<[1], [0], [0], [1], [0, 0, 1, 1], [], []>} : vector<8x8xf32>, vector<8x64xf32>, vector<8x64xf32> -> vector<8x64xf32>
    %c0_27 = arith.constant 0 : index
    %c0_28 = arith.constant 0 : index
    %c64 = arith.constant 64 : index
    %44 = vector.load %arg6[%c0_27, %c0_28, %c64] : memref<1x8x768xf32, #tpu.memory_space<vmem>>, vector<1x8x64xf32>
    %45 = vector.shape_cast %44 : vector<1x8x64xf32> to vector<8x64xf32>
    %46 = vector.shape_cast %43 : vector<8x64xf32> to vector<1x8x64xf32>
    tpu.vector_store %arg6[%c0_27, %c0_28, %c64], %46 {strides = array<i32>} : memref<1x8x768xf32, #tpu.memory_space<vmem>>, vector<1x8x64xf32>,
    %47 = vector.extract_strided_slice %27 {offsets = [2, 0, 0], sizes = [1, 8, 8], strides = [1, 1, 1]} : vector<12x8x8xf32> to vector<1x8x8xf32>
    %48 = vector.shape_cast %47 : vector<1x8x8xf32> to vector<8x8xf32>
    %49 = vector.extract_strided_slice %5 {offsets = [2, 0, 0], sizes = [1, 8, 64], strides = [1, 1, 1]} : vector<12x8x64xf32> to vector<1x8x64xf32>
    %50 = vector.shape_cast %49 : vector<1x8x64xf32> to vector<8x64xf32>
    %cst_29 = arith.constant dense<0.000000e+00> : vector<8x64xf32>
    %51 = tpu.matmul %48, %50, %cst_29 {dimension_numbers = #tpu.dot_dimension_numbers<[1], [0], [0], [1], [0, 0, 1, 1], [], []>} : vector<8x8xf32>, vector<8x64xf32>, vector<8x64xf32> -> vector<8x64xf32>
    %c0_30 = arith.constant 0 : index
    %c0_31 = arith.constant 0 : index
    %c128 = arith.constant 128 : index
    %52 = vector.load %arg6[%c0_30, %c0_31, %c128] : memref<1x8x768xf32, #tpu.memory_space<vmem>>, vector<1x8x64xf32>
    %53 = vector.shape_cast %52 : vector<1x8x64xf32> to vector<8x64xf32>
    %54 = vector.shape_cast %51 : vector<8x64xf32> to vector<1x8x64xf32>
    tpu.vector_store %arg6[%c0_30, %c0_31, %c128], %54 {strides = array<i32>} : memref<1x8x768xf32, #tpu.memory_space<vmem>>, vector<1x8x64xf32>,
    %55 = vector.extract_strided_slice %27 {offsets = [3, 0, 0], sizes = [1, 8, 8], strides = [1, 1, 1]} : vector<12x8x8xf32> to vector<1x8x8xf32>
    %56 = vector.shape_cast %55 : vector<1x8x8xf32> to vector<8x8xf32>
    %57 = vector.extract_strided_slice %5 {offsets = [3, 0, 0], sizes = [1, 8, 64], strides = [1, 1, 1]} : vector<12x8x64xf32> to vector<1x8x64xf32>
    %58 = vector.shape_cast %57 : vector<1x8x64xf32> to vector<8x64xf32>
    %cst_32 = arith.constant dense<0.000000e+00> : vector<8x64xf32>
    %59 = tpu.matmul %56, %58, %cst_32 {dimension_numbers = #tpu.dot_dimension_numbers<[1], [0], [0], [1], [0, 0, 1, 1], [], []>} : vector<8x8xf32>, vector<8x64xf32>, vector<8x64xf32> -> vector<8x64xf32>
    %c0_33 = arith.constant 0 : index
    %c0_34 = arith.constant 0 : index
    %c192 = arith.constant 192 : index
    %60 = vector.load %arg6[%c0_33, %c0_34, %c192] : memref<1x8x768xf32, #tpu.memory_space<vmem>>, vector<1x8x64xf32>
    %61 = vector.shape_cast %60 : vector<1x8x64xf32> to vector<8x64xf32>
    %62 = vector.shape_cast %59 : vector<8x64xf32> to vector<1x8x64xf32>
    tpu.vector_store %arg6[%c0_33, %c0_34, %c192], %62 {strides = array<i32>} : memref<1x8x768xf32, #tpu.memory_space<vmem>>, vector<1x8x64xf32>,
    %63 = vector.extract_strided_slice %27 {offsets = [4, 0, 0], sizes = [1, 8, 8], strides = [1, 1, 1]} : vector<12x8x8xf32> to vector<1x8x8xf32>
    %64 = vector.shape_cast %63 : vector<1x8x8xf32> to vector<8x8xf32>
    %65 = vector.extract_strided_slice %5 {offsets = [4, 0, 0], sizes = [1, 8, 64], strides = [1, 1, 1]} : vector<12x8x64xf32> to vector<1x8x64xf32>
    %66 = vector.shape_cast %65 : vector<1x8x64xf32> to vector<8x64xf32>
    %cst_35 = arith.constant dense<0.000000e+00> : vector<8x64xf32>
    %67 = tpu.matmul %64, %66, %cst_35 {dimension_numbers = #tpu.dot_dimension_numbers<[1], [0], [0], [1], [0, 0, 1, 1], [], []>} : vector<8x8xf32>, vector<8x64xf32>, vector<8x64xf32> -> vector<8x64xf32>
    %c0_36 = arith.constant 0 : index
    %c0_37 = arith.constant 0 : index
    %c256 = arith.constant 256 : index
    %68 = vector.load %arg6[%c0_36, %c0_37, %c256] : memref<1x8x768xf32, #tpu.memory_space<vmem>>, vector<1x8x64xf32>
    %69 = vector.shape_cast %68 : vector<1x8x64xf32> to vector<8x64xf32>
    %70 = vector.shape_cast %67 : vector<8x64xf32> to vector<1x8x64xf32>
    tpu.vector_store %arg6[%c0_36, %c0_37, %c256], %70 {strides = array<i32>} : memref<1x8x768xf32, #tpu.memory_space<vmem>>, vector<1x8x64xf32>,
    %71 = vector.extract_strided_slice %27 {offsets = [5, 0, 0], sizes = [1, 8, 8], strides = [1, 1, 1]} : vector<12x8x8xf32> to vector<1x8x8xf32>
    %72 = vector.shape_cast %71 : vector<1x8x8xf32> to vector<8x8xf32>
    %73 = vector.extract_strided_slice %5 {offsets = [5, 0, 0], sizes = [1, 8, 64], strides = [1, 1, 1]} : vector<12x8x64xf32> to vector<1x8x64xf32>
    %74 = vector.shape_cast %73 : vector<1x8x64xf32> to vector<8x64xf32>
    %cst_38 = arith.constant dense<0.000000e+00> : vector<8x64xf32>
    %75 = tpu.matmul %72, %74, %cst_38 {dimension_numbers = #tpu.dot_dimension_numbers<[1], [0], [0], [1], [0, 0, 1, 1], [], []>} : vector<8x8xf32>, vector<8x64xf32>, vector<8x64xf32> -> vector<8x64xf32>
    %c0_39 = arith.constant 0 : index
    %c0_40 = arith.constant 0 : index
    %c320 = arith.constant 320 : index
    %76 = vector.load %arg6[%c0_39, %c0_40, %c320] : memref<1x8x768xf32, #tpu.memory_space<vmem>>, vector<1x8x64xf32>
    %77 = vector.shape_cast %76 : vector<1x8x64xf32> to vector<8x64xf32>
    %78 = vector.shape_cast %75 : vector<8x64xf32> to vector<1x8x64xf32>
    tpu.vector_store %arg6[%c0_39, %c0_40, %c320], %78 {strides = array<i32>} : memref<1x8x768xf32, #tpu.memory_space<vmem>>, vector<1x8x64xf32>,
    %79 = vector.extract_strided_slice %27 {offsets = [6, 0, 0], sizes = [1, 8, 8], strides = [1, 1, 1]} : vector<12x8x8xf32> to vector<1x8x8xf32>
    %80 = vector.shape_cast %79 : vector<1x8x8xf32> to vector<8x8xf32>
    %81 = vector.extract_strided_slice %5 {offsets = [6, 0, 0], sizes = [1, 8, 64], strides = [1, 1, 1]} : vector<12x8x64xf32> to vector<1x8x64xf32>
    %82 = vector.shape_cast %81 : vector<1x8x64xf32> to vector<8x64xf32>
    %cst_41 = arith.constant dense<0.000000e+00> : vector<8x64xf32>
    %83 = tpu.matmul %80, %82, %cst_41 {dimension_numbers = #tpu.dot_dimension_numbers<[1], [0], [0], [1], [0, 0, 1, 1], [], []>} : vector<8x8xf32>, vector<8x64xf32>, vector<8x64xf32> -> vector<8x64xf32>
    %c0_42 = arith.constant 0 : index
    %c0_43 = arith.constant 0 : index
    %c384 = arith.constant 384 : index
    %84 = vector.load %arg6[%c0_42, %c0_43, %c384] : memref<1x8x768xf32, #tpu.memory_space<vmem>>, vector<1x8x64xf32>
    %85 = vector.shape_cast %84 : vector<1x8x64xf32> to vector<8x64xf32>
    %86 = vector.shape_cast %83 : vector<8x64xf32> to vector<1x8x64xf32>
    tpu.vector_store %arg6[%c0_42, %c0_43, %c384], %86 {strides = array<i32>} : memref<1x8x768xf32, #tpu.memory_space<vmem>>, vector<1x8x64xf32>,
    %87 = vector.extract_strided_slice %27 {offsets = [7, 0, 0], sizes = [1, 8, 8], strides = [1, 1, 1]} : vector<12x8x8xf32> to vector<1x8x8xf32>
    %88 = vector.shape_cast %87 : vector<1x8x8xf32> to vector<8x8xf32>
    %89 = vector.extract_strided_slice %5 {offsets = [7, 0, 0], sizes = [1, 8, 64], strides = [1, 1, 1]} : vector<12x8x64xf32> to vector<1x8x64xf32>
    %90 = vector.shape_cast %89 : vector<1x8x64xf32> to vector<8x64xf32>
    %cst_44 = arith.constant dense<0.000000e+00> : vector<8x64xf32>
    %91 = tpu.matmul %88, %90, %cst_44 {dimension_numbers = #tpu.dot_dimension_numbers<[1], [0], [0], [1], [0, 0, 1, 1], [], []>} : vector<8x8xf32>, vector<8x64xf32>, vector<8x64xf32> -> vector<8x64xf32>
    %c0_45 = arith.constant 0 : index
    %c0_46 = arith.constant 0 : index
    %c448 = arith.constant 448 : index
    %92 = vector.load %arg6[%c0_45, %c0_46, %c448] : memref<1x8x768xf32, #tpu.memory_space<vmem>>, vector<1x8x64xf32>
    %93 = vector.shape_cast %92 : vector<1x8x64xf32> to vector<8x64xf32>
    %94 = vector.shape_cast %91 : vector<8x64xf32> to vector<1x8x64xf32>
    tpu.vector_store %arg6[%c0_45, %c0_46, %c448], %94 {strides = array<i32>} : memref<1x8x768xf32, #tpu.memory_space<vmem>>, vector<1x8x64xf32>,
    %95 = vector.extract_strided_slice %27 {offsets = [8, 0, 0], sizes = [1, 8, 8], strides = [1, 1, 1]} : vector<12x8x8xf32> to vector<1x8x8xf32>
    %96 = vector.shape_cast %95 : vector<1x8x8xf32> to vector<8x8xf32>
    %97 = vector.extract_strided_slice %5 {offsets = [8, 0, 0], sizes = [1, 8, 64], strides = [1, 1, 1]} : vector<12x8x64xf32> to vector<1x8x64xf32>
    %98 = vector.shape_cast %97 : vector<1x8x64xf32> to vector<8x64xf32>
    %cst_47 = arith.constant dense<0.000000e+00> : vector<8x64xf32>
    %99 = tpu.matmul %96, %98, %cst_47 {dimension_numbers = #tpu.dot_dimension_numbers<[1], [0], [0], [1], [0, 0, 1, 1], [], []>} : vector<8x8xf32>, vector<8x64xf32>, vector<8x64xf32> -> vector<8x64xf32>
    %c0_48 = arith.constant 0 : index
    %c0_49 = arith.constant 0 : index
    %c512 = arith.constant 512 : index
    %100 = vector.load %arg6[%c0_48, %c0_49, %c512] : memref<1x8x768xf32, #tpu.memory_space<vmem>>, vector<1x8x64xf32>
    %101 = vector.shape_cast %100 : vector<1x8x64xf32> to vector<8x64xf32>
    %102 = vector.shape_cast %99 : vector<8x64xf32> to vector<1x8x64xf32>
    tpu.vector_store %arg6[%c0_48, %c0_49, %c512], %102 {strides = array<i32>} : memref<1x8x768xf32, #tpu.memory_space<vmem>>, vector<1x8x64xf32>,
    %103 = vector.extract_strided_slice %27 {offsets = [9, 0, 0], sizes = [1, 8, 8], strides = [1, 1, 1]} : vector<12x8x8xf32> to vector<1x8x8xf32>
    %104 = vector.shape_cast %103 : vector<1x8x8xf32> to vector<8x8xf32>
    %105 = vector.extract_strided_slice %5 {offsets = [9, 0, 0], sizes = [1, 8, 64], strides = [1, 1, 1]} : vector<12x8x64xf32> to vector<1x8x64xf32>
    %106 = vector.shape_cast %105 : vector<1x8x64xf32> to vector<8x64xf32>
    %cst_50 = arith.constant dense<0.000000e+00> : vector<8x64xf32>
    %107 = tpu.matmul %104, %106, %cst_50 {dimension_numbers = #tpu.dot_dimension_numbers<[1], [0], [0], [1], [0, 0, 1, 1], [], []>} : vector<8x8xf32>, vector<8x64xf32>, vector<8x64xf32> -> vector<8x64xf32>
    %c0_51 = arith.constant 0 : index
    %c0_52 = arith.constant 0 : index
    %c576 = arith.constant 576 : index
    %108 = vector.load %arg6[%c0_51, %c0_52, %c576] : memref<1x8x768xf32, #tpu.memory_space<vmem>>, vector<1x8x64xf32>
    %109 = vector.shape_cast %108 : vector<1x8x64xf32> to vector<8x64xf32>
    %110 = vector.shape_cast %107 : vector<8x64xf32> to vector<1x8x64xf32>
    tpu.vector_store %arg6[%c0_51, %c0_52, %c576], %110 {strides = array<i32>} : memref<1x8x768xf32, #tpu.memory_space<vmem>>, vector<1x8x64xf32>,
    %111 = vector.extract_strided_slice %27 {offsets = [10, 0, 0], sizes = [1, 8, 8], strides = [1, 1, 1]} : vector<12x8x8xf32> to vector<1x8x8xf32>
    %112 = vector.shape_cast %111 : vector<1x8x8xf32> to vector<8x8xf32>
    %113 = vector.extract_strided_slice %5 {offsets = [10, 0, 0], sizes = [1, 8, 64], strides = [1, 1, 1]} : vector<12x8x64xf32> to vector<1x8x64xf32>
    %114 = vector.shape_cast %113 : vector<1x8x64xf32> to vector<8x64xf32>
    %cst_53 = arith.constant dense<0.000000e+00> : vector<8x64xf32>
    %115 = tpu.matmul %112, %114, %cst_53 {dimension_numbers = #tpu.dot_dimension_numbers<[1], [0], [0], [1], [0, 0, 1, 1], [], []>} : vector<8x8xf32>, vector<8x64xf32>, vector<8x64xf32> -> vector<8x64xf32>
    %c0_54 = arith.constant 0 : index
    %c0_55 = arith.constant 0 : index
    %c640 = arith.constant 640 : index
    %116 = vector.load %arg6[%c0_54, %c0_55, %c640] : memref<1x8x768xf32, #tpu.memory_space<vmem>>, vector<1x8x64xf32>
    %117 = vector.shape_cast %116 : vector<1x8x64xf32> to vector<8x64xf32>
    %118 = vector.shape_cast %115 : vector<8x64xf32> to vector<1x8x64xf32>
    tpu.vector_store %arg6[%c0_54, %c0_55, %c640], %118 {strides = array<i32>} : memref<1x8x768xf32, #tpu.memory_space<vmem>>, vector<1x8x64xf32>,
    %119 = vector.extract_strided_slice %27 {offsets = [11, 0, 0], sizes = [1, 8, 8], strides = [1, 1, 1]} : vector<12x8x8xf32> to vector<1x8x8xf32>
    %120 = vector.shape_cast %119 : vector<1x8x8xf32> to vector<8x8xf32>
    %121 = vector.extract_strided_slice %5 {offsets = [11, 0, 0], sizes = [1, 8, 64], strides = [1, 1, 1]} : vector<12x8x64xf32> to vector<1x8x64xf32>
    %122 = vector.shape_cast %121 : vector<1x8x64xf32> to vector<8x64xf32>
    %cst_56 = arith.constant dense<0.000000e+00> : vector<8x64xf32>
    %123 = tpu.matmul %120, %122, %cst_56 {dimension_numbers = #tpu.dot_dimension_numbers<[1], [0], [0], [1], [0, 0, 1, 1], [], []>} : vector<8x8xf32>, vector<8x64xf32>, vector<8x64xf32> -> vector<8x64xf32>
    %c0_57 = arith.constant 0 : index
    %c0_58 = arith.constant 0 : index
    %c704 = arith.constant 704 : index
    %124 = vector.load %arg6[%c0_57, %c0_58, %c704] : memref<1x8x768xf32, #tpu.memory_space<vmem>>, vector<1x8x64xf32>
    %125 = vector.shape_cast %124 : vector<1x8x64xf32> to vector<8x64xf32>
    %126 = vector.shape_cast %123 : vector<8x64xf32> to vector<1x8x64xf32>
    tpu.vector_store %arg6[%c0_57, %c0_58, %c704], %126 {strides = array<i32>} : memref<1x8x768xf32, #tpu.memory_space<vmem>>, vector<1x8x64xf32>,
    return
  }
  func.func @transform_0(%arg0: i32, %arg1: i32) -> (i32, i32, i32, i32) {
    %c0_i32 = arith.constant 0 : i32
    %c0_i32_0 = arith.constant 0 : i32
    %c0_i32_1 = arith.constant 0 : i32
    return %arg0, %c0_i32, %arg1, %c0_i32_0 : i32, i32, i32, i32
  }
  func.func @transform_1(%arg0: i32, %arg1: i32) -> (i32, i32, i32, i32) {
    %c0_i32 = arith.constant 0 : i32
    %c0_i32_0 = arith.constant 0 : i32
    %c0_i32_1 = arith.constant 0 : i32
    %c0_i32_2 = arith.constant 0 : i32
    return %arg0, %c0_i32, %c0_i32_0, %c0_i32_1 : i32, i32, i32, i32
  }
  func.func @transform_2(%arg0: i32, %arg1: i32) -> (i32, i32, i32, i32) {
    %c0_i32 = arith.constant 0 : i32
    %c0_i32_0 = arith.constant 0 : i32
    %c0_i32_1 = arith.constant 0 : i32
    %c0_i32_2 = arith.constant 0 : i32
    return %arg0, %c0_i32, %c0_i32_0, %c0_i32_1 : i32, i32, i32, i32
  }
  func.func @transform_3(%arg0: i32, %arg1: i32) -> (i32, i32, i32) {
    %c0_i32 = arith.constant 0 : i32
    %c0_i32_0 = arith.constant 0 : i32
    return %arg0, %arg1, %c0_i32 : i32, i32, i32
  }
  func.func @transform_4(%arg0: i32, %arg1: i32) -> (i32, i32, i32) {
    %c0_i32 = arith.constant 0 : i32
    %c0_i32_0 = arith.constant 0 : i32
    return %arg0, %arg1, %c0_i32 : i32, i32, i32
  }
  func.func @transform_5(%arg0: i32, %arg1: i32) -> (i32, i32, i32, i32) {
    %c0_i32 = arith.constant 0 : i32
    %c0_i32_0 = arith.constant 0 : i32
    %c0_i32_1 = arith.constant 0 : i32
    return %arg0, %c0_i32, %arg1, %c0_i32_0 : i32, i32, i32, i32
  }
}

</mosaic_0001>

<bundles_post_ra>
// kernel: tpu_custom_call.1
= control target key start
LH: loop header
LB: loop body
LE: loop exit
PB: predicated region body
PF: predicated region fallthrough
CT: control target
= control target key end

     0   :  { %s3815_s0 = inlined_call_operand.hbm [shape: f32[2,12,8,64], index: 0, kind: input, shape index: {}]   ;;  %s3816_s1 = inlined_call_operand.hbm [shape: f32[2,12,8,64], index: 1, kind: input, shape index: {}]   ;;  %s3817_s2 = inlined_call_operand.hbm [shape: f32[2,12,8,64], index: 2, kind: input, shape index: {}]   ;;  %s3818_s3 = inlined_call_operand.vmem [shape: s8[2,8,8], index: 3, kind: input, shape index: {}]   ;;  %s3819_s4 = inlined_call_operand.hbm [shape: f32[2,8,768], index: 4, kind: output, shape index: {0}]   ;;  %s3820_s5 = inlined_call_operand.vmem [shape: f32[2,12,8,8], index: 5, kind: output, shape index: {1}]  }
   0x1   :  { %3833 = sst [smem:[#allocation17_spill]] %s3816_s1 }
   0x2   :  { %11 = vsyncpa [#allocation3], 0 }
   0x3   :  { %13 = vsyncpa [#allocation3 + $0x1], 0 }
   0x4   :  { %14 = vsyncpa [#allocation6], 0 }
   0x5   :  { %16 = vsyncpa [#allocation6 + $0x1], 0 }
   0x6   :  { %17 = vsyncpa [#allocation4], 0 }
   0x7   :  { %19 = vsyncpa [#allocation4 + $0x1], 0  ;;  %s3202_s18 = smov 0   ;;  %s3204_s19 = smov 0  }
   0x8   :  { %s3206_s20 = smov 0   ;;  %s3208_s21 = smov 0  }
   0x9   :  { %s3210_s22 = smov 0   ;;  %s3212_s23 = smov 0  }
   0xa LB: > { %3834 = sst [smem:[#allocation12_spill]] %s3156_s22  ;;  %s3233_s24 = sadd.s32 4294967295, %s3160_s23   ;;  %s3160_s23 = sphi %s3212_s23, %s25_s23   ;;  %s3156_s22 = sphi %s3210_s22, %s3863_s22   ;;  %s3152_s21 = sphi %s3208_s21, %s3862_s21   ;;  %s3148_s20 = sphi %s3206_s20, %s3866_s20   ;;  %s3144_s19 = sphi %s3204_s19, %s3865_s19   ;;  %s3140_s18 = sphi %s3202_s18, %s3864_s18  }
   0xb   : > { %3835 = sst [smem:[#allocation13_spill]] %s3160_s23  ;;  %s2632_s25 = sadd.s32 4294967294, %s3160_s23  }
   0xc   : > { %s37_s26 = sadd.s32 1, %s3156_s22  ;;  %s46_s27 = sadd.s32 1, %s3148_s20 }
   0xd   : > { %p39_p0 = scmp.ge.s32.totalorder %s37_s26, 2  ;;  %p53_p1 = scmp.ne.s32.totalorder %s3148_s20, %s3144_s19 }
   0xe   : > { %p54_p2 = scmp.eq.s32.totalorder %s3160_s23, 0  ;;  %p59_p3 = scmp.ne.s32.totalorder %s3144_s19, %s3140_s18 }
   0xf   : > { %s3868_s26 = smov (%p39_p0, %s37_s26), 0  ;;  %p60_p5 = scmp.eq.s32.totalorder %s3233_s24, 0 }
  0x10   : > { %3836 = sst [smem:[#allocation14_spill]] %s3868_s26  ;;  %p3245_p4 = por %p54_p2, %p53_p1 }
  0x11   : > { %s41_s29 = ssub.s32 %s3156_s22, %s3868_s26  ;;  %p165_p6 = scmp.eq.s32.totalorder %s3233_s24, 1 }
  0x12   : > { %p44_p7 = scmp.eq.s32.totalorder %s41_s29, 0  ;;  %p3253_p8 = por %p60_p5, %p59_p3 }
  0x13   : > { %p3257_p9 = por %p165_p6, %p53_p1  ;;  %p171_p10 = scmp.eq.s32.totalorder %s2632_s25, 1 }
  0x14   : > { %s3838_s30 = scalar_select %p3253_p8, 1, 0 }
  0x15   : > { %s3839_s6 = scalar_select %p3257_p9, 1, 0 }
  0x16   : > { %s3262_s7 = scalar_select %p44_p7, %s3148_s20, %s46_s27  }
  0x17   : > { %p3264_p11 = por %p171_p10, %p59_p3  ;;  %p2880_p13 = scmp.lt.s32.totalorder %s3160_s23, 2 }
  0x18   : > { %3840 = sst [smem:[#allocation15_spill]] %s3262_s7  ;;  %s3821_s9 = sand.u32 1, %s3148_s20  }
  0x19   : > { %s3841_s8 = scalar_select %p3264_p11, 1, 0 }
  0x1a   : > { %s3273_s10 = smul.u32 96, %s3821_s9  ;;  %p3280_p0 = pnand %p2880_p13, %p3245_p4 }
  0x1b   : > { %3842 = sst [smem:[#allocation16_spill]] %s3841_s8  ;;  %s3276_s11 = smul.u32 1536, %s3156_s22 }
  0x1c   : > { %s241_s13 = sand.u32 1, %s3160_s23   ;;  %s3844_s1 = sld [smem:[#allocation17_spill]] }
  0x1d   : > { %s245_s17 = scalar_lea.vmem [#allocation5], %s3273_s10  ;;  %s3296_s27 = scalar_lea.sflag [#allocation6], %s241_s13 }
  0x1e   : > { %s252_s25 = sshll.u32 %s245_s17, 4  ;;  %p3302_p4 = pneg %p3280_p0  ;;  %s3293_s25 = int_to_ptr.vmem [resolvable:$true] %s252_s25 }
  0x22   : > { %s3289_s16 = scalar_lea.hbm %s3844_s1, %s3276_s11  ;;  %s2989_s17 = scalar_lea.hbm %s3844_s1, 3072 }
  0x23   : > { %s2984_s28 = scalar_lea.hbm %s3289_s16, 1536  ;;  %p2990_p7 = scmp.lt.u32.totalorder %s3289_s16, %s3844_s1 }
  0x24   : > { %p2985_p3 = scmp.ne.s32.totalorder %s3289_s16, %s2984_s28  ;;  %p2991_p10 = scmp.lt.u32.totalorder %s2989_s17, %s2984_s28 }
  0x25   : > { %p2993_p12 = scmp.lt.u32.totalorder %s2984_s28, %s3289_s16 }
  0x26   : > { %p2987_p5 = pnand %p3302_p4, %p2985_p3  ;;  %p2992_p13 = por %p2991_p10, %p2990_p7 }
  0x28   : > { %p2988_p6 = pneg %p2987_p5  ;;  %p2994_p1 = por %p2993_p12, %p2992_p13 }
  0x2a   : > { %p2995_p2 = pnand %p2994_p1, %p2988_p6 }
  0x2c   : > { %2998 = shalt.err (!%p2995_p2)
}
  0x2d   : > { %s2999_s13 = scalar_lea.vmem %s3293_s25, 1536  ;;  %s3162_s14 = smov [#allocation5]  }
  0x2e   : > { %p3000_p3 = scmp.ne.s32.totalorder %s3293_s25, %s2999_s13  ;;  %s3004_s15 = sshll.u32 %s3162_s14, 4  ;;  %s3005_s15 = int_to_ptr.vmem [resolvable:$false] %s3004_s15 }
  0x2f   : > { %s3006_s26 = scalar_lea.vmem %s3005_s15, 3072  ;;  %p3007_p9 = scmp.lt.s32.totalorder %s3293_s25, %s3005_s15 }
  0x30   : > { %p3002_p5 = pnand %p3000_p3, %p3302_p4  ;;  %p3008_p8 = scmp.lt.s32.totalorder %s3006_s26, %s2999_s13 }
  0x32   : > { %p3003_p11 = pneg %p3002_p5  ;;  %p3009_p7 = por %p3008_p8, %p3007_p9 }
  0x34   : > { %p3010_p10 = pnand %p3009_p7, %p3003_p11 }
  0x36   : > { %3013 = shalt.err (!%p3010_p10)
}
  0x37   : > { %s3825_s9 = smov 128   ;;  %s3827_s28 = smov 8  }
  0x38   : > { %2872 = dma.hbm_to_vmem [thread:$0]  (!%p3280_p0), %s3289_s16, 1536, %s3293_s25, %s3296_s27, %s3825_s9, %s3825_s9, %s3827_s28  }
  0x39   : > { %p3846_p8 = scmp.lt.s32.totalorder %s3160_s23, 3  ;;  %p3847_p9 = scmp.ge.s32.totalorder %s3160_s23, 1 }
  0x3a   : > { %s3341_s15 = scalar_lea.hbm %s3815_s0, %s3276_s11  ;;  %s223_s26 = scalar_lea.vmem [#allocation2], %s3273_s10 }
  0x3b   : > { %p3333_p11 = pnand %p3847_p9, %p3846_p8  ;;  %s231_s1 = sshll.u32 %s223_s26, 4  ;;  %s3344_s1 = int_to_ptr.vmem [resolvable:$true] %s231_s1 }
  0x3c   : > { %s3350_s9 = scalar_lea.hbm %s3817_s2, %s3276_s11  ;;  %s3849_s28 = sand.u32 1, %s3148_s20  }
  0x3d   : > { %s3848_s17 = scalar_select %p3333_p11, 1, 0 }
  0x3e   : > { %s3354_s22 = scalar_lea.sflag [#allocation3], %s3849_s28  ;;  %s3014_s7 = scalar_lea.hbm %s3341_s15, 1536 }
  0x3f   : > { %p3015_p12 = scmp.ne.s32.totalorder %s3341_s15, %s3014_s7  ;;  %s3019_s23 = scalar_lea.hbm %s3815_s0, 3072 }
  0x40   : > { %p3020_p6 = scmp.lt.u32.totalorder %s3341_s15, %s3815_s0  ;;  %p3021_p13 = scmp.lt.u32.totalorder %s3019_s23, %s3014_s7 }
  0x41   : > { %p3017_p1 = pnand %p3015_p12, %p3302_p4  ;;  %p3023_p5 = scmp.lt.u32.totalorder %s3014_s7, %s3341_s15 }
  0x42   : > { %p3022_p3 = por %p3021_p13, %p3020_p6 }
  0x43   : > { %p3018_p2 = pneg %p3017_p1 }
  0x44   : > { %p3024_p7 = por %p3023_p5, %p3022_p3 }
  0x46   : > { %p3025_p10 = pnand %p3024_p7, %p3018_p2 }
  0x48   : > { %3028 = shalt.err (!%p3025_p10)
}
  0x49   : > { %s3029_s11 = scalar_lea.vmem %s3344_s1, 1536  ;;  %s3165_s28 = smov [#allocation2]  }
  0x4a   : > { %p3030_p8 = scmp.ne.s32.totalorder %s3344_s1, %s3029_s11  ;;  %s3034_s16 = sshll.u32 %s3165_s28, 4  ;;  %s3035_s16 = int_to_ptr.vmem [resolvable:$false] %s3034_s16 }
  0x4b   : > { %s3036_s8 = scalar_lea.vmem %s3035_s16, 3072  ;;  %p3037_p1 = scmp.lt.s32.totalorder %s3344_s1, %s3035_s16 }
  0x4c   : > { %p3032_p9 = pnand %p3030_p8, %p3302_p4  ;;  %p3038_p11 = scmp.lt.s32.totalorder %s3036_s8, %s3029_s11 }
  0x4e   : > { %p3033_p12 = pneg %p3032_p9  ;;  %p3039_p6 = por %p3038_p11, %p3037_p1 }
  0x50   : > { %p3040_p13 = pnand %p3039_p6, %p3033_p12 }
  0x52   : > { %3043 = shalt.err (!%p3040_p13)
}
  0x53   : > { %s3850_s23 = smov 8   ;;  %s3851_s7 = smov 128  }
  0x54   : > { %2869 = dma.hbm_to_vmem [thread:$0]  (!%p3280_p0), %s3341_s15, 1536, %s3344_s1, %s3354_s22, %s3851_s7, %s3851_s7, %s3850_s23  }
  0x55   : > { %s266_s25 = scalar_lea.vmem [#allocation7], %s3273_s10  ;;  %s3044_s14 = scalar_lea.hbm %s3350_s9, 1536 }
  0x56   : > { %s273_s13 = sshll.u32 %s266_s25, 4  ;;  %p3045_p11 = scmp.ne.s32.totalorder %s3350_s9, %s3044_s14  ;;  %s3382_s13 = int_to_ptr.vmem [resolvable:$true] %s273_s13 }
  0x57   : > { %s3049_s28 = scalar_lea.hbm %s3817_s2, 3072  ;;  %p3050_p5 = scmp.lt.u32.totalorder %s3350_s9, %s3817_s2 }
  0x58   : > { %p3047_p2 = pnand %p3045_p11, %p3302_p4  ;;  %p3051_p7 = scmp.lt.u32.totalorder %s3049_s28, %s3044_s14 }
  0x59   : > { %p3053_p8 = scmp.lt.u32.totalorder %s3044_s14, %s3350_s9 }
  0x5a   : > { %p3048_p3 = pneg %p3047_p2  ;;  %p3052_p10 = por %p3051_p7, %p3050_p5 }
  0x5c   : > { %p3054_p9 = por %p3053_p8, %p3052_p10 }
  0x5e   : > { %p3055_p12 = pnand %p3054_p9, %p3048_p3 }
  0x60   : > { %3058 = shalt.err (!%p3055_p12)
}
  0x61   : > { %s3059_s1 = scalar_lea.vmem %s3382_s13, 1536  ;;  %s3166_s22 = smov [#allocation7]  }
  0x62   : > { %p3060_p1 = scmp.ne.s32.totalorder %s3382_s13, %s3059_s1  ;;  %s3064_s10 = sshll.u32 %s3166_s22, 4  ;;  %s3065_s10 = int_to_ptr.vmem [resolvable:$false] %s3064_s10 }
  0x63   : > { %s3066_s15 = scalar_lea.vmem %s3065_s10, 3072  ;;  %p3067_p11 = scmp.lt.s32.totalorder %s3382_s13, %s3065_s10 }
  0x64   : > { %p3062_p6 = pnand %p3060_p1, %p3302_p4  ;;  %p3068_p2 = scmp.lt.s32.totalorder %s3066_s15, %s3059_s1 }
  0x66   : > { %p3063_p13 = pneg %p3062_p6  ;;  %p3069_p5 = por %p3068_p2, %p3067_p11 }
  0x68   : > { %p3070_p7 = pnand %p3069_p5, %p3063_p13 }
  0x6a   : > { %3073 = shalt.err (!%p3070_p7)
}
  0x6b   : > { %2875 = dma.hbm_to_vmem [thread:$0]  (!%p3280_p0), %s3350_s9, 1536, %s3382_s13, %s3296_s27, %s3851_s7, %s3851_s7, %s3850_s23  }
  0x6c   : > { %p3852_p4 = scmp.ne.s32.totalorder %s3848_s17, 0 }
  0x6d   : > { %s3412_s29 = sand.u32 (!%p3852_p4), 1, %s3144_s19   ;;  %p3853_p3 = scmp.ne.s32.totalorder (!%p3852_p4), %s3838_s30, 0 }
  0x6e   : > { %295 = sbr.rel (%p3852_p4) target bundleno = 1015 (0x3f7), region = 36  ;;  %s298_s12 = scalar_lea.sflag (!%p3852_p4), [#allocation3], %s3412_s29 }
  0x6f   : > { %s3415_s25 = smul.u32 (!%p3852_p4), 96, %s3412_s29 }
  0x71   : > { %s3419_s14 = scalar_lea.vmem (!%p3852_p4), [#allocation2], %s3415_s25 }
  0x75   : > { %3127 = dma.done.wait (%p3853_p3), %s298_s12, 1536  }
  0x76   : > { %3129 = vsyncadd (%p3853_p3), %s298_s12, 4294965760  ;;  %s306_s27 = sand.u32 1, %s3233_s24   ;;  %s3427_s17 = scalar_lea.vmem [#allocation5], %s3415_s25 }
  0x77   : > { %s307_s9 = scalar_lea.sflag [#allocation6], %s306_s27 }
  0x78   : > { %3131 = dma.done.wait (%p3853_p3), %s307_s9, 3072  }
  0x79   : > { %3133 = vsyncadd (%p3853_p3), %s307_s9, 4294964224  ;;  %v3167_v0 = vmov 0.0   ;;  %vm3168_vm0 = vmmov 0   ;;  %vm437_vm1 = vcmask 523264   ;;  %v401_v1 = vld [vmem:[%s3427_s17 + $0x8] sm:$0xff]  ;;  %v391_v4 = vld [vmem:[%s3419_s14 + $0x18] sm:$0xff] }
  0x7a   : > { %2733 = vmatprep.subr.mxu1 %v3167_v0  ;;  %2735 = vmatprep.mubr.msk.f32.mxu1 %vm3168_vm0, %v3167_v0  ;;  %v389_v2 = vld [vmem:[%s3419_s14 + $0x8] sm:$0xff]  ;;  %v403_v5 = vld [vmem:[%s3427_s17 + $0x18] sm:$0xff]  ;;  %v400_v6 = vld [vmem:[%s3427_s17] sm:$0xff]  ;;  %v428_v9 = vmul.f32 0.125, %v391_v4  ;;  %p371_p0 = scmp.lt.s32.totalorder %s3152_s21, 1  ;;  %v3169_v38 = vmov 0  }
  0x7b   : > { %2728 = vmatprep.subr.mxu0 %v3167_v0  ;;  %2730 = vmatprep.mubr.msk.f32.mxu0 %vm3168_vm0, %v3167_v0  ;;  %v426_v3 = vmul.f32 0.125, %v389_v2  ;;  %v388_v7 = vld [vmem:[%s3419_s14] sm:$0xff]  ;;  %v402_v10 = vld [vmem:[%s3427_s17 + $0x10] sm:$0xff]  ;;  %v393_v12 = vld [vmem:[%s3419_s14 + $0x28] sm:$0xff]  ;;  %vm1368_vm4 = vcmask 64512   ;;  %s3626_s26 = scalar_lea.vmem [#allocation7], %s3415_s25 }
  0x7c   : > { %2734 = vmatpush3.xpose.msk.msra.mxu1 %vm437_vm1, %v401_v1  ;;  %2729 = vmatpush3.xpose.msk.msra.mxu0 %vm437_vm1, %v400_v6  ;;  %v425_v8 = vmul.f32 0.125, %v388_v7  ;;  %v390_v11 = vld [vmem:[%s3419_s14 + $0x10] sm:$0xff]  ;;  %v405_v13 = vld [vmem:[%s3427_s17 + $0x28] sm:$0xff]  ;;  %v392_v15 = vld [vmem:[%s3419_s14 + $0x20] sm:$0xff]  ;;  %v430_v16 = vmul.f32 0.125, %v393_v12  ;;  %s3525_s24 = scalar_select %p371_p0, %s3152_s21, 1 }
  0x7d   : > { %2743 = vmatprep.subr.mxu1 %v3167_v0  ;;  %2738 = vmatprep.subr.mxu0 %v3167_v0  ;;  %v427_v14 = vmul.f32 0.125, %v390_v11  ;;  %v404_v17 = vld [vmem:[%s3427_s17 + $0x20] sm:$0xff]  ;;  %v395_v18 = vld [vmem:[%s3419_s14 + $0x38] sm:$0xff]  ;;  %v429_v20 = vmul.f32 0.125, %v392_v15  ;;  %v394_v21 = vld [vmem:[%s3419_s14 + $0x30] sm:$0xff]  ;;  %s3170_s1 = smov 64  }
  0x7e   : > { %v407_v19 = vld [vmem:[%s3427_s17 + $0x38] sm:$0xff]  ;;  %v432_v22 = vmul.f32 0.125, %v395_v18  ;;  %v406_v23 = vld [vmem:[%s3427_s17 + $0x30] sm:$0xff]  ;;  %v397_v24 = vld [vmem:[%s3419_s14 + $0x48] sm:$0xff]  ;;  %v431_v26 = vmul.f32 0.125, %v394_v21  ;;  %s2639_s30 = sshll.u32 %s3525_s24, 1 }
  0x7f   : > { %2736 = vmatmul.mubr.msk.f32.vlgmr.msra.gmra.mrb[0].mxu1 %vm437_vm1, %v426_v3  ;;  %2731 = vmatmul.mubr.msk.f32.vlgmr.msra.gmra.mrb[0].mxu0 %vm437_vm1, %v425_v8  ;;  %v409_v25 = vld [vmem:[%s3427_s17 + $0x48] sm:$0xff]  ;;  %v396_v27 = vld [vmem:[%s3419_s14 + $0x40] sm:$0xff]  ;;  %v434_v28 = vmul.f32 0.125, %v397_v24  ;;  %v399_v30 = vld [vmem:[%s3419_s14 + $0x58] sm:$0xff]  ;;  %s377_s13 = scalar_lea.vmem %s3818_s3, %s2639_s30  ;;  %s2856_s11 = smul.u32 96, %s3525_s24  ;;  %vm1664_vm5 = vcmask 1048064  }
  0x80   : > { %2744 = vmatpush3.xpose.msk.msra.mxu1 %vm437_vm1, %v403_v5  ;;  %2745 = vmatprep.mubr.msk.f32.mxu1 %vm3168_vm0, %v3167_v0  ;;  %v408_v29 = vld [vmem:[%s3427_s17 + $0x40] sm:$0xff]  ;;  %v411_v31 = vld [vmem:[%s3427_s17 + $0x58] sm:$0xff]  ;;  %v433_v32 = vmul.f32 0.125, %v396_v27  ;;  %v398_v33 = vld [vmem:[%s3419_s14 + $0x50] sm:$0xff]  ;;  %v436_v34 = vmul.f32 0.125, %v399_v30  ;;  %s2855_s22 = smul.u32 48, %s3412_s29 }
  0x81   : > { %2753 = vmatprep.subr.mxu1 %v3167_v0  ;;  %2739 = vmatpush3.xpose.msk.msra.mxu0 %vm437_vm1, %v402_v10  ;;  %v410_v35 = vld [vmem:[%s3427_s17 + $0x50] sm:$0xff]  ;;  %v435_v36 = vmul.f32 0.125, %v398_v33  ;;  %v424_v37 = vld [vmem:[%s377_s13] sm:$0x3]  ;;  %s3646_s8 = scalar_lea.vmem %s3820_s5, %s2856_s11  ;;  %s2857_s15 = smul.u32 768, %s3152_s21 }
  0x82   : > { %2740 = vmatprep.mubr.msk.f32.mxu0 %vm3168_vm0, %v3167_v0  ;;  %2748 = vmatprep.subr.mxu0 %v3167_v0  ;;  %vm1350_vm2 = vnez %v424_v37  ;;  %s3735_s10 = scalar_lea.vmem [#allocation8], %s2855_s22  ;;  %s2427_s9 = scalar_lea.sflag [#allocation4], %s3412_s29 }
  0x83   : > { %2746 = vmatmul.mubr.msk.f32.vlgmr.msra.gmra.mrb[2].mxu1 %vm437_vm1, %v428_v9  ;;  %v1351_v39 = vsel %vm1350_vm2, 16843009, %v3169_v38  ;;  %s2451_s25 = sshll.u32 %s3735_s10, 4  ;;  %s3764_s27 = scalar_lea.hbm %s3819_s4, %s2857_s15  ;;  %s3766_s25 = int_to_ptr.vmem [resolvable:$true] %s2451_s25 }
  0x84   : > { %2754 = vmatpush3.xpose.msk.msra.mxu1 %vm437_vm1, %v405_v13  ;;  %2755 = vmatprep.mubr.msk.f32.mxu1 %vm3168_vm0, %v3167_v0  ;;  %v1352_v40 = vunpack.c.0.s8 %v1351_v39  ;;  %s3074_s17 = scalar_lea.vmem %s3766_s25, 768  ;;  %p3856_p8 = scmp.ne.s32.totalorder %s3839_s6, 0 }
  0x85   : > { %2763 = vmatprep.subr.mxu1 %v3167_v0  ;;  %2741 = vmatmul.mubr.msk.f32.vlgmr.msra.gmra.mrb[2].mxu0 %vm437_vm1, %v427_v14  ;;  %p3075_p10 = scmp.ne.s32.totalorder %s3766_s25, %s3074_s17  ;;  %s3171_s21 = smov [#allocation8]  }
  0x86   : > { %2749 = vmatpush3.xpose.msk.msra.mxu0 %vm437_vm1, %v404_v17  ;;  %2750 = vmatprep.mubr.msk.f32.mxu0 %vm3168_vm0, %v3167_v0  ;;  %vm3531_vm3 = vcmp.ne.s32.totalorder %v1352_v40, 0  ;;  %s3078_s24 = sshll.u32 %s3171_s21, 4  ;;  %s3079_s24 = int_to_ptr.vmem [resolvable:$false] %s3078_s24 }
  0x87   : > { %2756 = vmatmul.mubr.msk.f32.vlgmr.msra.gmra.mrb[4].mxu1 %vm437_vm1, %v430_v16  ;;  %2758 = vmatprep.subr.mxu0 %v3167_v0  ;;  %p3076_p9 = pnand %p3075_p10, %p3856_p8  ;;  %s3080_s30 = scalar_lea.vmem %s3079_s24, 1536 }
  0x88   : > { %2764 = vmatpush3.xpose.msk.msra.mxu1 %vm437_vm1, %v407_v19  ;;  %2765 = vmatprep.mubr.msk.f32.mxu1 %vm3168_vm0, %v3167_v0  ;;  %p3081_p1 = scmp.lt.s32.totalorder %s3766_s25, %s3079_s24  ;;  %p3082_p6 = scmp.lt.s32.totalorder %s3080_s30, %s3074_s17 }
  0x89   : > { %2773 = vmatprep.subr.mxu1 %v3167_v0  ;;  %2751 = vmatmul.mubr.msk.f32.vlgmr.msra.gmra.mrb[4].mxu0 %vm437_vm1, %v429_v20  ;;  %p3077_p12 = pneg %p3076_p9 }
  0x8a   : > { %2759 = vmatpush3.xpose.msk.msra.mxu0 %vm437_vm1, %v406_v23  ;;  %2760 = vmatprep.mubr.msk.f32.mxu0 %vm3168_vm0, %v3167_v0  ;;  %p3083_p13 = por %p3082_p6, %p3081_p1 }
  0x8b   : > { %2766 = vmatmul.mubr.msk.f32.vlgmr.msra.gmra.mrb[6].mxu1 %vm437_vm1, %v432_v22  ;;  %2768 = vmatprep.subr.mxu0 %v3167_v0 }
  0x8c   : > { %2774 = vmatpush3.xpose.msk.msra.mxu1 %vm437_vm1, %v409_v25  ;;  %2775 = vmatprep.mubr.msk.f32.mxu1 %vm3168_vm0, %v3167_v0  ;;  %p3084_p11 = pnand %p3083_p13, %p3077_p12 }
  0x8d   : > { %2783 = vmatprep.subr.mxu1 %v3167_v0  ;;  %2761 = vmatmul.mubr.msk.f32.vlgmr.msra.gmra.mrb[6].mxu0 %vm437_vm1, %v431_v26 }
  0x8e   : > { %2769 = vmatpush3.xpose.msk.msra.mxu0 %vm437_vm1, %v408_v29  ;;  %2770 = vmatprep.mubr.msk.f32.mxu0 %vm3168_vm0, %v3167_v0 }
  0x8f   : > { %2776 = vmatmul.mubr.msk.f32.vlgmr.msra.gmra.mrb[8].mxu1 %vm437_vm1, %v434_v28  ;;  %2778 = vmatprep.subr.mxu0 %v3167_v0 }
  0x90   : > { %2784 = vmatpush3.xpose.msk.msra.mxu1 %vm437_vm1, %v411_v31  ;;  %2785 = vmatprep.mubr.msk.f32.mxu1 %vm3168_vm0, %v3167_v0 }
  0x91   : > { %2771 = vmatmul.mubr.msk.f32.vlgmr.msra.gmra.mrb[8].mxu0 %vm437_vm1, %v433_v32  ;;  %2793 = vmatprep.subr.mxu1 %v3167_v0 }
  0x92   : > { %2779 = vmatpush3.xpose.msk.msra.mxu0 %vm437_vm1, %v410_v35  ;;  %2780 = vmatprep.mubr.msk.f32.mxu0 %vm3168_vm0, %v3167_v0 }
  0x93   : > { %2786 = vmatmul.mubr.msk.f32.vlgmr.msra.gmra.mrb[10].mxu1 %vm437_vm1, %v436_v34  ;;  %2788 = vmatprep.subr.mxu0 %v3167_v0 }
  0x94   : > { %2795 = vmatprep.mubr.msk.f32.mxu1 %vm3168_vm0, %v3167_v0 }
  0x95   : > { %2781 = vmatmul.mubr.msk.f32.vlgmr.msra.gmra.mrb[10].mxu0 %vm437_vm1, %v435_v36 }
  0x96   : > { %2790 = vmatprep.mubr.msk.f32.mxu0 %vm3168_vm0, %v3167_v0 }
 0x152   : > { %v586_v42 = vpop.f32.mrb[0].mxu1  ;;  %v510_v46 = vpop.f32.mrb[0].mxu0 }
 0x153   : > { %v1357_v43 = vsel %vm3531_vm3, -1e+09, %v586_v42  ;;  %v2737_v44 = vpop.f32.mrb[1].mxu1  ;;  %v2732_v47 = vpop.f32.mrb[1].mxu0  ;;  %v1356_v6 = vsel %vm3531_vm3, -1e+09, %v510_v46 }
 0x154   : > { %v1372_v45 = vsel %vm1368_vm4, %v1357_v43, -inf  ;;  %v1369_v12 = vsel %vm1368_vm4, %v1356_v6, -inf }
 0x155   : > { %1373 = vmax.xlane.f32.xlu0 %v1372_v45 }
 0x156   : > { %v738_v48 = vpop.f32.mrb[2].mxu1 }
 0x157   : > { %v1359_v49 = vsel %vm3531_vm3, -1e+09, %v738_v48  ;;  %v2747_v50 = vpop.f32.mrb[3].mxu1 }
 0x158   : > { %v1378_v51 = vsel %vm1368_vm4, %v1359_v49, -inf  ;;  %v662_v52 = vpop.f32.mrb[2].mxu0 }
 0x159   : > { %1379 = vmax.xlane.f32.xlu0 %v1378_v51  ;;  %v2742_v53 = vpop.f32.mrb[3].mxu0  ;;  %v3554_v11 = vsel %vm3531_vm3, -1e+09, %v662_v52 }
 0x15a   : > { %v890_v54 = vpop.f32.mrb[4].mxu1  ;;  %v1375_v19 = vsel %vm1368_vm4, %v3554_v11, -inf }
 0x15b   : > { %v1361_v55 = vsel %vm3531_vm3, -1e+09, %v890_v54  ;;  %v2757_v56 = vpop.f32.mrb[5].mxu1 }
 0x15c   : > { %v1384_v57 = vsel %vm1368_vm4, %v1361_v55, -inf  ;;  %v814_v58 = vpop.f32.mrb[4].mxu0 }
 0x15d   : > { %1385 = vmax.xlane.f32.xlu1 %v1384_v57  ;;  %v2752_v59 = vpop.f32.mrb[5].mxu0  ;;  %v1360_v15 = vsel %vm3531_vm3, -1e+09, %v814_v58 }
 0x15e   : > { %v1042_v60 = vpop.f32.mrb[6].mxu1  ;;  %v1381_v20 = vsel %vm1368_vm4, %v1360_v15, -inf }
 0x15f   : > { %v1363_v61 = vsel %vm3531_vm3, -1e+09, %v1042_v60  ;;  %v2767_v62 = vpop.f32.mrb[7].mxu1 }
 0x160   : > { %v1390_v63 = vsel %vm1368_vm4, %v1363_v61, -inf  ;;  %v966_v1 = vpop.f32.mrb[6].mxu0 }
 0x161   : > { %1391 = vmax.xlane.f32.xlu1 %v1390_v63  ;;  %v2762_v2 = vpop.f32.mrb[7].mxu0  ;;  %v3567_v21 = vsel %vm3531_vm3, -1e+09, %v966_v1 }
 0x162   : > { %v1194_v3 = vpop.f32.mrb[8].mxu1  ;;  %v1387_v23 = vsel %vm1368_vm4, %v3567_v21, -inf }
 0x163   : > { %v1365_v4 = vsel %vm3531_vm3, -1e+09, %v1194_v3  ;;  %v2777_v5 = vpop.f32.mrb[9].mxu1 }
 0x164   : > { %v1396_v7 = vsel %vm1368_vm4, %v1365_v4, -inf  ;;  %v1118_v8 = vpop.f32.mrb[8].mxu0 }
 0x165   : > { %1397 = vmax.xlane.f32.xlu0 %v1396_v7  ;;  %v2772_v9 = vpop.f32.mrb[9].mxu0  ;;  %v3571_v22 = vsel %vm3531_vm3, -1e+09, %v1118_v8 }
 0x166   : > { %v1346_v10 = vpop.f32.mrb[10].mxu1  ;;  %v1393_v24 = vsel %vm1368_vm4, %v3571_v22, -inf }
 0x167   : > { %v1367_v13 = vsel %vm3531_vm3, -1e+09, %v1346_v10  ;;  %v2787_v14 = vpop.f32.mrb[11].mxu1 }
 0x168   : > { %v1402_v16 = vsel %vm1368_vm4, %v1367_v13, -inf  ;;  %v1270_v17 = vpop.f32.mrb[10].mxu0 }
 0x169   : > { %1403 = vmax.xlane.f32.xlu1 %v1402_v16  ;;  %1370 = vmax.xlane.f32.xlu0 %v1369_v12  ;;  %v2782_v18 = vpop.f32.mrb[11].mxu0  ;;  %v3579_v25 = vsel %vm3531_vm3, -1e+09, %v1270_v17 }
 0x16a   : > { %v1399_v26 = vsel %vm1368_vm4, %v3579_v25, -inf }
 0x16d   : > { %1376 = vmax.xlane.f32.xlu1 %v1375_v19  ;;  %1382 = vmax.xlane.f32.xlu0 %v1381_v20  ;;  %v413_v19 = vld [vmem:[%s3626_s26 + $0x8] sm:$0xff] }
 0x16e   : > { %2794 = vmatpush3.msra.mxu1 %v413_v19 }
 0x16f   : > { %2803 = vmatprep.subr.mxu1 %v3167_v0 }
 0x171   : > { %1388 = vmax.xlane.f32.xlu1 %v1387_v23  ;;  %1394 = vmax.xlane.f32.xlu0 %v1393_v24 }
 0x175   : > { %1400 = vmax.xlane.f32.xlu1 %v1399_v26 }
 0x1e2   : > { %v1374_v27 = vpop.xlane.xlu0 %1373 }
 0x1e3   : > { %v1406_v28 = vsub.f32 %v1357_v43, %v1374_v27 }
 0x1e5   : > { %v1419_v29 = vmul.f32 1.442695, %v1406_v28 }
 0x1e6   : > { %v1380_v30 = vpop.xlane.xlu0 %1379 }
 0x1e7   : > { %2936 = vpow2.f32 %v1419_v29  ;;  %v1408_v31 = vsub.f32 %v1359_v49, %v1380_v30 }
 0x1e9   : > { %v1423_v32 = vmul.f32 1.442695, %v1408_v31 }
 0x1ea   : > { %v1386_v33 = vpop.xlane.xlu1 %1385 }
 0x1eb   : > { %2938 = vpow2.f32 %v1423_v32  ;;  %v1410_v34 = vsub.f32 %v1361_v55, %v1386_v33  ;;  %v415_v32 = vld [vmem:[%s3626_s26 + $0x18] sm:$0xff] }
 0x1ed   : > { %v1427_v35 = vmul.f32 1.442695, %v1410_v34 }
 0x1ee   : > { %v1392_v36 = vpop.xlane.xlu1 %1391 }
 0x1ef   : > { %2940 = vpow2.f32 %v1427_v35  ;;  %v1412_v37 = vsub.f32 %v1363_v61, %v1392_v36  ;;  %v417_v36 = vld [vmem:[%s3626_s26 + $0x28] sm:$0xff] }
 0x1f1   : > { %v3583_v38 = vpop.eup %2936  ;;  %v1431_v39 = vmul.f32 1.442695, %v1412_v37 }
 0x1f2   : > { %v1398_v40 = vpop.xlane.xlu0 %1397  ;;  %v1444_v41 = vsel %vm1368_vm4, %v3583_v38, 0.0 }
 0x1f3   : > { %2942 = vpow2.f32 %v1431_v39  ;;  %v1414_v42 = vsub.f32 %v1365_v4, %v1398_v40  ;;  %1445 = vadd.xlane.f32.xlu0 %v1444_v41  ;;  %v419_v40 = vld [vmem:[%s3626_s26 + $0x38] sm:$0xff] }
 0x1f5   : > { %v3587_v43 = vpop.eup %2938  ;;  %v1435_v44 = vmul.f32 1.442695, %v1414_v42 }
 0x1f6   : > { %v1404_v45 = vpop.xlane.xlu1 %1403  ;;  %v1371_v46 = vpop.xlane.xlu0 %1370  ;;  %v1450_v47 = vsel %vm1368_vm4, %v3587_v43, 0.0 }
 0x1f7   : > { %2944 = vpow2.f32 %v1435_v44  ;;  %v1416_v48 = vsub.f32 %v1367_v13, %v1404_v45  ;;  %v1405_v49 = vsub.f32 %v1356_v6, %v1371_v46  ;;  %1451 = vadd.xlane.f32.xlu1 %v1450_v47  ;;  %v421_v45 = vld [vmem:[%s3626_s26 + $0x48] sm:$0xff] }
 0x1f9   : > { %v3591_v50 = vpop.eup %2940  ;;  %v1439_v51 = vmul.f32 1.442695, %v1416_v48  ;;  %v1417_v52 = vmul.f32 1.442695, %v1405_v49 }
 0x1fa   : > { %v1377_v53 = vpop.xlane.xlu1 %1376  ;;  %v1383_v54 = vpop.xlane.xlu0 %1382  ;;  %v1456_v55 = vsel %vm1368_vm4, %v3591_v50, 0.0 }
 0x1fb   : > { %2946 = vpow2.f32 %v1439_v51  ;;  %v1407_v56 = vsub.f32 %v3554_v11, %v1377_v53  ;;  %v1409_v57 = vsub.f32 %v1360_v15, %v1383_v54  ;;  %1457 = vadd.xlane.f32.xlu0 %v1456_v55 }
 0x1fc   : > { %2948 = vpow2.f32 %v1417_v52 }
 0x1fd   : > { %v3596_v58 = vpop.eup %2942  ;;  %v1421_v59 = vmul.f32 1.442695, %v1407_v56  ;;  %v1425_v60 = vmul.f32 1.442695, %v1409_v57  ;;  %v414_v57 = vld [vmem:[%s3626_s26 + $0x10] sm:$0xff] }
 0x1fe   : > { %v1389_v61 = vpop.xlane.xlu1 %1388  ;;  %v1395_v62 = vpop.xlane.xlu0 %1394  ;;  %v1462_v63 = vsel %vm1368_vm4, %v3596_v58, 0.0 }
 0x1ff   : > { %2950 = vpow2.f32 %v1421_v59  ;;  %v1411_v1 = vsub.f32 %v3567_v21, %v1389_v61  ;;  %v1413_v2 = vsub.f32 %v3571_v22, %v1395_v62  ;;  %1463 = vadd.xlane.f32.xlu1 %v1462_v63  ;;  %v416_v62 = vld [vmem:[%s3626_s26 + $0x20] sm:$0xff] }
 0x200   : > { %2952 = vpow2.f32 %v1425_v60 }
 0x201   : > { %v3602_v3 = vpop.eup %2944  ;;  %v1429_v4 = vmul.f32 1.442695, %v1411_v1  ;;  %v1433_v5 = vmul.f32 1.442695, %v1413_v2 }
 0x202   : > { %v1401_v6 = vpop.xlane.xlu1 %1400  ;;  %v1468_v7 = vsel %vm1368_vm4, %v3602_v3, 0.0 }
 0x203   : > { %2954 = vpow2.f32 %v1429_v4  ;;  %v1415_v8 = vsub.f32 %v3579_v25, %v1401_v6  ;;  %1469 = vadd.xlane.f32.xlu0 %v1468_v7  ;;  %v412_v25 = vld [vmem:[%s3626_s26] sm:$0xff]  ;;  %v418_v4 = vld [vmem:[%s3626_s26 + $0x30] sm:$0xff] }
 0x204   : > { %2956 = vpow2.f32 %v1433_v5  ;;  %2789 = vmatpush3.msra.mxu0 %v412_v25  ;;  %v420_v7 = vld [vmem:[%s3626_s26 + $0x40] sm:$0xff] }
 0x205   : > { %v3607_v9 = vpop.eup %2946  ;;  %v1437_v10 = vmul.f32 1.442695, %v1415_v8  ;;  %2798 = vmatprep.subr.mxu0 %v3167_v0  ;;  %v422_v8 = vld [vmem:[%s3626_s26 + $0x50] sm:$0xff] }
 0x206   : > { %v3609_v11 = vpop.eup %2948  ;;  %v1474_v12 = vsel %vm1368_vm4, %v3607_v9, 0.0 }
 0x207   : > { %2958 = vpow2.f32 %v1437_v10  ;;  %v1441_v13 = vsel %vm1368_vm4, %v3609_v11, 0.0  ;;  %1475 = vadd.xlane.f32.xlu1 %v1474_v12 }
 0x208   : > { %1442 = vadd.xlane.f32.xlu0 %v1441_v13 }
 0x209   : > { %v3615_v14 = vpop.eup %2950 }
 0x20a   : > { %v3617_v15 = vpop.eup %2952  ;;  %v1447_v16 = vsel %vm1368_vm4, %v3615_v14, 0.0 }
 0x20b   : > { %v1453_v17 = vsel %vm1368_vm4, %v3617_v15, 0.0  ;;  %1448 = vadd.xlane.f32.xlu1 %v1447_v16 }
 0x20c   : > { %1454 = vadd.xlane.f32.xlu0 %v1453_v17 }
 0x20d   : > { %v3623_v18 = vpop.eup %2954 }
 0x20e   : > { %v3629_v20 = vpop.eup %2956  ;;  %v1459_v21 = vsel %vm1368_vm4, %v3623_v18, 0.0 }
 0x20f   : > { %v1465_v22 = vsel %vm1368_vm4, %v3629_v20, 0.0  ;;  %1460 = vadd.xlane.f32.xlu1 %v1459_v21 }
 0x210   : > { %1466 = vadd.xlane.f32.xlu0 %v1465_v22 }
 0x211   : > { %v3636_v23 = vpop.eup %2958 }
 0x212   : > { %v1471_v24 = vsel %vm1368_vm4, %v3636_v23, 0.0 }
 0x213   : > { %1472 = vadd.xlane.f32.xlu1 %v1471_v24 }
 0x280   : > { %v1446_v26 = vpop.xlane.xlu0 %1445 }
 0x281   : > { %2960 = vrcp.f32 %v1446_v26 }
 0x284   : > { %v1452_v27 = vpop.xlane.xlu1 %1451 }
 0x285   : > { %2962 = vrcp.f32 %v1452_v27 }
 0x288   : > { %v1458_v28 = vpop.xlane.xlu0 %1457 }
 0x289   : > { %2964 = vrcp.f32 %v1458_v28 }
 0x28b   : > { %v2961_v29 = vpop.eup %2960 }
 0x28c   : > { %v1490_v30 = vmul.f32 %v2961_v29, %v3583_v38  ;;  %v1464_v31 = vpop.xlane.xlu1 %1463 }
 0x28d   : > { %2966 = vrcp.f32 %v1464_v31 }
 0x28e   : > { %1502 = vst.msk [vmem:[%s3646_s8 + $0x8] sm:$0xff] %vm1368_vm4, %v1490_v30  ;;  %2796 = vmatmul.mubr.msk.f32.vlgmr.msra.gmra.mrb[12].mxu1 %vm1368_vm4, %v1490_v30 }
 0x28f   : > { %v2963_v33 = vpop.eup %2962  ;;  %2804 = vmatpush3.msra.mxu1 %v415_v32  ;;  %2805 = vmatprep.mubr.msk.f32.mxu1 %vm3168_vm0, %v3167_v0 }
 0x290   : > { %v1492_v34 = vmul.f32 %v2963_v33, %v3587_v43  ;;  %v1470_v35 = vpop.xlane.xlu0 %1469  ;;  %2813 = vmatprep.subr.mxu1 %v3167_v0 }
 0x291   : > { %2968 = vrcp.f32 %v1470_v35 }
 0x292   : > { %1504 = vst.msk [vmem:[%s3646_s8 + $0x18] sm:$0xff] %vm1368_vm4, %v1492_v34  ;;  %2806 = vmatmul.mubr.msk.f32.vlgmr.msra.gmra.mrb[14].mxu1 %vm1368_vm4, %v1492_v34 }
 0x293   : > { %v2965_v37 = vpop.eup %2964  ;;  %2814 = vmatpush3.msra.mxu1 %v417_v36  ;;  %2815 = vmatprep.mubr.msk.f32.mxu1 %vm3168_vm0, %v3167_v0 }
 0x294   : > { %v1494_v38 = vmul.f32 %v2965_v37, %v3591_v50  ;;  %v1476_v39 = vpop.xlane.xlu1 %1475  ;;  %2823 = vmatprep.subr.mxu1 %v3167_v0  ;;  %v423_v50 = vld [vmem:[%s3626_s26 + $0x58] sm:$0xff] }
 0x295   : > { %v1443_v41 = vpop.xlane.xlu0 %1442  ;;  %2970 = vrcp.f32 %v1476_v39 }
 0x296   : > { %1506 = vst.msk [vmem:[%s3646_s8 + $0x28] sm:$0xff] %vm1368_vm4, %v1494_v38  ;;  %2972 = vrcp.f32 %v1443_v41  ;;  %2816 = vmatmul.mubr.msk.f32.vlgmr.msra.gmra.mrb[16].mxu1 %vm1368_vm4, %v1494_v38 }
 0x297   : > { %v2967_v42 = vpop.eup %2966  ;;  %2824 = vmatpush3.msra.mxu1 %v419_v40  ;;  %2825 = vmatprep.mubr.msk.f32.mxu1 %vm3168_vm0, %v3167_v0 }
 0x298   : > { %v1496_v43 = vmul.f32 %v2967_v42, %v3596_v58  ;;  %v1449_v44 = vpop.xlane.xlu1 %1448  ;;  %2833 = vmatprep.subr.mxu1 %v3167_v0 }
 0x299   : > { %v1455_v46 = vpop.xlane.xlu0 %1454  ;;  %2974 = vrcp.f32 %v1449_v44 }
 0x29a   : > { %1508 = vst.msk [vmem:[%s3646_s8 + $0x38] sm:$0xff] %vm1368_vm4, %v1496_v43  ;;  %2976 = vrcp.f32 %v1455_v46  ;;  %2826 = vmatmul.mubr.msk.f32.vlgmr.msra.gmra.mrb[18].mxu1 %vm1368_vm4, %v1496_v43 }
 0x29b   : > { %v2969_v47 = vpop.eup %2968  ;;  %2834 = vmatpush3.msra.mxu1 %v421_v45  ;;  %2835 = vmatprep.mubr.msk.f32.mxu1 %vm3168_vm0, %v3167_v0 }
 0x29c   : > { %v1498_v48 = vmul.f32 %v2969_v47, %v3602_v3  ;;  %v1461_v49 = vpop.xlane.xlu1 %1460  ;;  %2843 = vmatprep.subr.mxu1 %v3167_v0 }
 0x29d   : > { %v1467_v51 = vpop.xlane.xlu0 %1466  ;;  %2978 = vrcp.f32 %v1461_v49 }
 0x29e   : > { %1510 = vst.msk [vmem:[%s3646_s8 + $0x48] sm:$0xff] %vm1368_vm4, %v1498_v48  ;;  %2980 = vrcp.f32 %v1467_v51  ;;  %2836 = vmatmul.mubr.msk.f32.vlgmr.msra.gmra.mrb[20].mxu1 %vm1368_vm4, %v1498_v48 }
 0x29f   : > { %v2971_v52 = vpop.eup %2970  ;;  %2844 = vmatpush3.msra.mxu1 %v423_v50  ;;  %2845 = vmatprep.mubr.msk.f32.mxu1 %vm3168_vm0, %v3167_v0 }
 0x2a0   : > { %v2973_v53 = vpop.eup %2972  ;;  %v1500_v54 = vmul.f32 %v2971_v52, %v3607_v9  ;;  %v1473_v55 = vpop.xlane.xlu1 %1472 }
 0x2a1   : > { %v1489_v56 = vmul.f32 %v2973_v53, %v3609_v11  ;;  %2982 = vrcp.f32 %v1473_v55 }
 0x2a2   : > { %1512 = vst.msk [vmem:[%s3646_s8 + $0x58] sm:$0xff] %vm1368_vm4, %v1500_v54  ;;  %2846 = vmatmul.mubr.msk.f32.vlgmr.msra.gmra.mrb[22].mxu1 %vm1368_vm4, %v1500_v54 }
 0x2a3   : > { %v2975_v58 = vpop.eup %2974  ;;  %1501 = vst.msk [vmem:[%s3646_s8] sm:$0xff] %vm1368_vm4, %v1489_v56  ;;  %2791 = vmatmul.mubr.msk.f32.vlgmr.msra.gmra.mrb[12].mxu0 %vm1368_vm4, %v1489_v56 }
 0x2a4   : > { %v2977_v59 = vpop.eup %2976  ;;  %v1491_v60 = vmul.f32 %v2975_v58, %v3615_v14  ;;  %2799 = vmatpush3.msra.mxu0 %v414_v57  ;;  %2800 = vmatprep.mubr.msk.f32.mxu0 %vm3168_vm0, %v3167_v0 }
 0x2a5   : > { %v1493_v61 = vmul.f32 %v2977_v59, %v3617_v15  ;;  %2808 = vmatprep.subr.mxu0 %v3167_v0 }
 0x2a6   : > { %1503 = vst.msk [vmem:[%s3646_s8 + $0x10] sm:$0xff] %vm1368_vm4, %v1491_v60 }
 0x2a7   : > { %v2979_v63 = vpop.eup %2978  ;;  %1505 = vst.msk [vmem:[%s3646_s8 + $0x20] sm:$0xff] %vm1368_vm4, %v1493_v61  ;;  %2801 = vmatmul.mubr.msk.f32.vlgmr.msra.gmra.mrb[14].mxu0 %vm1368_vm4, %v1491_v60 }
 0x2a8   : > { %v2981_v1 = vpop.eup %2980  ;;  %v1495_v2 = vmul.f32 %v2979_v63, %v3623_v18  ;;  %2809 = vmatpush3.msra.mxu0 %v416_v62  ;;  %2810 = vmatprep.mubr.msk.f32.mxu0 %vm3168_vm0, %v3167_v0 }
 0x2a9   : > { %v1497_v3 = vmul.f32 %v2981_v1, %v3629_v20  ;;  %2818 = vmatprep.subr.mxu0 %v3167_v0 }
 0x2aa   : > { %1507 = vst.msk [vmem:[%s3646_s8 + $0x30] sm:$0xff] %vm1368_vm4, %v1495_v2 }
 0x2ab   : > { %v2983_v5 = vpop.eup %2982  ;;  %1509 = vst.msk [vmem:[%s3646_s8 + $0x40] sm:$0xff] %vm1368_vm4, %v1497_v3  ;;  %2811 = vmatmul.mubr.msk.f32.vlgmr.msra.gmra.mrb[16].mxu0 %vm1368_vm4, %v1493_v61 }
 0x2ac   : > { %v1499_v6 = vmul.f32 %v2983_v5, %v3636_v23  ;;  %2819 = vmatpush3.msra.mxu0 %v418_v4  ;;  %2820 = vmatprep.mubr.msk.f32.mxu0 %vm3168_vm0, %v3167_v0 }
 0x2ad   : > { %2828 = vmatprep.subr.mxu0 %v3167_v0 }
 0x2ae   : > { %1511 = vst.msk [vmem:[%s3646_s8 + $0x50] sm:$0xff] %vm1368_vm4, %v1499_v6 }
 0x2af   : > { %2821 = vmatmul.mubr.msk.f32.vlgmr.msra.gmra.mrb[18].mxu0 %vm1368_vm4, %v1495_v2 }
 0x2b0   : > { %2829 = vmatpush3.msra.mxu0 %v420_v7  ;;  %2830 = vmatprep.mubr.msk.f32.mxu0 %vm3168_vm0, %v3167_v0 }
 0x2b1   : > { %2838 = vmatprep.subr.mxu0 %v3167_v0 }
 0x2b3   : > { %2831 = vmatmul.mubr.msk.f32.vlgmr.msra.gmra.mrb[20].mxu0 %vm1368_vm4, %v1497_v3 }
 0x2b4   : > { %2839 = vmatpush3.msra.mxu0 %v422_v8  ;;  %2840 = vmatprep.mubr.msk.f32.mxu0 %vm3168_vm0, %v3167_v0 }
 0x2b7   : > { %2841 = vmatmul.mubr.msk.f32.vlgmr.msra.gmra.mrb[22].mxu0 %vm1368_vm4, %v1499_v6 }
 0x361   : > { %v1656_v9 = vpop.f32.mrb[12].mxu1 }
 0x362   : > { %1661 = vrot.lane.b32.xlu0 %v1656_v9, %s3170_s1  ;;  %v2797_v10 = vpop.f32.mrb[13].mxu1 }
 0x365   : > { %v1809_v11 = vpop.f32.mrb[14].mxu1 }
 0x366   : > { %1814 = vrot.lane.b32.xlu1 %v1809_v11, %s3170_s1  ;;  %v2807_v12 = vpop.f32.mrb[15].mxu1 }
 0x369   : > { %v1961_v13 = vpop.f32.mrb[16].mxu1 }
 0x36a   : > { %1966 = vrot.lane.b32.xlu1 %v1961_v13, %s3170_s1  ;;  %v2817_v14 = vpop.f32.mrb[17].mxu1 }
 0x36d   : > { %v2113_v15 = vpop.f32.mrb[18].mxu1 }
 0x36e   : > { %2118 = vrot.lane.b32.xlu1 %v2113_v15, %s3170_s1  ;;  %v2827_v16 = vpop.f32.mrb[19].mxu1 }
 0x371   : > { %v2265_v17 = vpop.f32.mrb[20].mxu1 }
 0x372   : > { %2270 = vrot.lane.b32.xlu0 %v2265_v17, %s3170_s1  ;;  %v2837_v18 = vpop.f32.mrb[21].mxu1 }
 0x375   : > { %v2417_v0 = vpop.f32.mrb[22].mxu1 }
 0x376   : > { %v1582_v19 = vpop.f32.mrb[12].mxu0  ;;  %2422 = vrot.lane.b32.xlu1 %v2417_v0, %s3170_s1  ;;  %v2847_v20 = vpop.f32.mrb[23].mxu1 }
 0x377   : > { %1586 = vst.msk [vmem:[%s3735_s10] sm:$0xff] %vm437_vm1, %v1582_v19  ;;  %v2792_v21 = vpop.f32.mrb[13].mxu0 }
 0x37a   : > { %v1735_v22 = vpop.f32.mrb[14].mxu0 }
 0x37b   : > { %1739 = vst.msk [vmem:[%s3735_s10 + $0x8] sm:$0xff] %vm437_vm1, %v1735_v22  ;;  %v2802_v23 = vpop.f32.mrb[15].mxu0 }
 0x37e   : > { %v1887_v24 = vpop.f32.mrb[16].mxu0 }
 0x37f   : > { %1891 = vst.msk [vmem:[%s3735_s10 + $0x10] sm:$0xff] %vm437_vm1, %v1887_v24  ;;  %v2812_v25 = vpop.f32.mrb[17].mxu0 }
 0x382   : > { %v2039_v26 = vpop.f32.mrb[18].mxu0 }
 0x383   : > { %2043 = vst.msk [vmem:[%s3735_s10 + $0x18] sm:$0xff] %vm437_vm1, %v2039_v26  ;;  %v2822_v27 = vpop.f32.mrb[19].mxu0 }
 0x386   : > { %v2191_v28 = vpop.f32.mrb[20].mxu0 }
 0x387   : > { %2195 = vst.msk [vmem:[%s3735_s10 + $0x20] sm:$0xff] %vm437_vm1, %v2191_v28  ;;  %v2832_v29 = vpop.f32.mrb[21].mxu0 }
 0x38a   : > { %v2343_v30 = vpop.f32.mrb[22].mxu0 }
 0x38b   : > { %2347 = vst.msk [vmem:[%s3735_s10 + $0x28] sm:$0xff] %vm437_vm1, %v2343_v30  ;;  %v2842_v31 = vpop.f32.mrb[23].mxu0 }
 0x3d4   : > { %v1662_v32 = vpop.permute.xlu0 %1661 }
 0x3d5   : > { %1665 = vst.msk [vmem:[%s3735_s10] sm:$0xff] %vm1664_vm5, %v1662_v32 }
 0x3d8   : > { %v1815_v33 = vpop.permute.xlu1 %1814 }
 0x3d9   : > { %1817 = vst.msk [vmem:[%s3735_s10 + $0x8] sm:$0xff] %vm1664_vm5, %v1815_v33 }
 0x3dc   : > { %v1967_v34 = vpop.permute.xlu1 %1966 }
 0x3dd   : > { %1969 = vst.msk [vmem:[%s3735_s10 + $0x10] sm:$0xff] %vm1664_vm5, %v1967_v34 }
 0x3e0   : > { %v2119_v35 = vpop.permute.xlu1 %2118 }
 0x3e1   : > { %2121 = vst.msk [vmem:[%s3735_s10 + $0x18] sm:$0xff] %vm1664_vm5, %v2119_v35 }
 0x3e4   : > { %v2271_v36 = vpop.permute.xlu0 %2270 }
 0x3e5   : > { %2273 = vst.msk [vmem:[%s3735_s10 + $0x20] sm:$0xff] %vm1664_vm5, %v2271_v36 }
 0x3e8   : > { %v2423_v37 = vpop.permute.xlu1 %2422 }
 0x3e9   : > { %2425 = vst.msk [vmem:[%s3735_s10 + $0x28] sm:$0xff] %vm1664_vm5, %v2423_v37 }
 0x3ea   : > { %3087 = shalt.err (!%p3084_p11)
}
 0x3eb   : > { %s3088_s29 = scalar_lea.hbm %s3764_s27, 768  ;;  %s3092_s13 = scalar_lea.hbm %s3819_s4, 1536 }
 0x3ec   : > { %p3089_p2 = scmp.ne.s32.totalorder %s3764_s27, %s3088_s29  ;;  %p3093_p4 = scmp.lt.u32.totalorder %s3764_s27, %s3819_s4 }
 0x3ed   : > { %p3094_p3 = scmp.lt.u32.totalorder %s3092_s13, %s3088_s29  ;;  %p3096_p10 = scmp.lt.u32.totalorder %s3088_s29, %s3764_s27 }
 0x3ee   : > { %p3090_p5 = pnand %p3089_p2, %p3856_p8 }
 0x3ef   : > { %p3095_p0 = por %p3094_p3, %p3093_p4 }
 0x3f0   : > { %p3091_p7 = pneg %p3090_p5 }
 0x3f1   : > { %p3097_p9 = por %p3096_p10, %p3095_p0 }
 0x3f3   : > { %p3098_p12 = pnand %p3097_p9, %p3091_p7 }
 0x3f5   : > { %3101 = shalt.err (!%p3098_p12)
}
 0x3f6   : > { %2864 = dma.vmem_to_hbm [thread:$0]  (%p3856_p8), %s3766_s25, 768, %s3764_s27, %s2427_s9  }
 0x3f7 PF: > { %s3857_s28 = sld [smem:[#allocation16_spill]]  ;;  %s3858_s16 = sld [smem:[#allocation13_spill]] }
 0x3f8   : > { %s2466_s8 = sand.u32 1, %s3140_s18  }
 0x3f9   : > { %s2467_s1 = scalar_lea.sflag [#allocation4], %s2466_s8 }
 0x3fd   : > { %p3859_p1 = scmp.ne.s32.totalorder %s3857_s28, 0  ;;  %p3860_p6 = scmp.ge.s32.totalorder %s3858_s16, 2 }
 0x3ff   : > { %p2877_p13 = pnand %p3860_p6, %p3859_p1 }
 0x401   : > { %3135 = dma.done.wait (!%p2877_p13), %s2467_s1, 768  }
 0x402   : > { %3137 = vsyncadd (!%p2877_p13), %s2467_s1, 4294966528  ;;  %s25_s23 = sadd.s32 1, %s3858_s16   ;;  %s3861_s6 = sld [smem:[#allocation15_spill]] }
 0x403   : > { %p22_p11 = scmp.ge.s32.totalorder %s25_s23, 4   ;;  %s3862_s21 = sld [smem:[#allocation12_spill]] }
 0x404   : > { %s3863_s22 = sld [smem:[#allocation14_spill]]  ;;  %s3864_s18 = smov %s3144_s19 }
 0x405   : > { %s3865_s19 = smov %s3148_s20  ;;  %24 = sbr.rel (!%p22_p11) target bundleno = 10 (0xa), region = 120 }
 0x408   : > { %s3866_s20 = smov %s3861_s6 }
 0x40c   :  { %2483 = vsyncpa [#allocation3], 1 }
 0x40d   :  { %2485 = vsyncpa [#allocation3 + $0x1], 1 }
 0x40e   :  { %2486 = vsyncpa [#allocation6], 1 }
 0x40f   :  { %2488 = vsyncpa [#allocation6 + $0x1], 1 }
 0x410   :  { %2489 = vsyncpa [#allocation4], 1 }
 0x411   :  { %2491 = vsyncpa [#allocation4 + $0x1], 1 }

</bundles_post_ra>
